<compile_context>
chip_gen: v5e
topology: v5e:2x2
jax: 0.10.0
libtpu: 0.0.40
codegen_flags: <defaults>
</compile_context>

<pallas_src>
import jax
import jax.numpy as jnp
from jax.experimental import pallas as pl
from jax.experimental.pallas import tpu as pltpu

WIN_SIZE = 11
WIN_SIGMA = 1.5
DATA_RANGE = 255.0            # pytorch_msssim default
K1, K2 = 0.01, 0.03
C1 = (K1 * DATA_RANGE) ** 2
C2 = (K2 * DATA_RANGE) ** 2


def _gaussian_window(win_size, sigma):
    coords = jnp.arange(win_size, dtype=jnp.float32) - win_size // 2
    g = jnp.exp(-(coords ** 2) / (2.0 * sigma ** 2))
    return g / jnp.sum(g)


def _band_matrix(g, n_in, win_size):
    """Banded matrix A (n_out, n_in) so that A @ v == VALID 1-D conv of v with g."""
    n_out = n_in - win_size + 1
    rows = jnp.arange(n_out)[:, None]
    cols = jnp.arange(n_in)[None, :]
    k = cols - rows
    valid = (k >= 0) & (k < win_size)
    return jnp.where(valid, g[jnp.clip(k, 0, win_size - 1)], 0.0).astype(jnp.float32)


def _round_up(x, m):
    return ((x + m - 1) // m) * m


def _tpu_vmem_bytes():
    try:
        return int(pltpu.get_tpu_info().vmem_capacity_bytes)
    except Exception:
        return 64 * 1024 * 1024   # conservative (v7x-sized) fallback


def _make_kernel(b_blk, h_pad, w, wo_pad, ho_pad, wo, ho):
    inv_hw = 1.0 / float(ho * wo)
    need_mask = (wo_pad != wo) or (ho_pad != ho)

    def kernel(x_ref, y_ref, awt_ref, aht_ref, out_ref):
        # x/y blocks: (B, Hp, W) in native dtype; cast in-kernel (keeps the
        # HBM->VMEM DMA at native width for bf16/uint8 inputs).
        xf = x_ref[...].astype(jnp.float32)
        yf = y_ref[...].astype(jnp.float32)
        awt = awt_ref[...]                         # (W,  Wop) W-axis band matrix
        aht = aht_ref[...]                         # (Hp, Hop) H-axis band matrix^T

        def gfilter(s):
            # Pass 1: W-axis Gaussian (VALID) — batch folded into M,
            # weight-stationary MXU matmul.
            c = jnp.dot(s.reshape(b_blk * h_pad, w), awt,
                        preferred_element_type=jnp.float32)
            c = c.reshape(b_blk, h_pad, wo_pad)
            # Pass 2: H-axis Gaussian — XLU minor-dims transpose, then ONE
            # weight-stationary matmul against ah.T (no 5B-way broadcast of the
            # band matrix, no batched einsum).
            ct = jnp.swapaxes(c, -1, -2)            # (B, Wop, Hp)
            f = jnp.dot(ct.reshape(b_blk * wo_pad, h_pad), aht,
                        preferred_element_type=jnp.float32)
            return f.reshape(b_blk, wo_pad, ho_pad)

        # Five independent filter passes (no concatenate slab); awt/aht stay
        # resident in VMEM across all five.
        mu1 = gfilter(xf)
        mu2 = gfilter(yf)
        xx_f = gfilter(xf * xf)
        yy_f = gfilter(yf * yf)
        xy_f = gfilter(xf * yf)

        mu1_sq = mu1 * mu1
        mu2_sq = mu2 * mu2
        mu1_mu2 = mu1 * mu2
        sigma1_sq = xx_f - mu1_sq
        sigma2_sq = yy_f - mu2_sq
        sigma12 = xy_f - mu1_mu2

        # Single-divide SSIM map (layout is (B, Wo_pad, Ho_pad); padded
        # positions evaluate to 1 and are masked out of the mean below).
        numer = (2.0 * mu1_mu2 + C1) * (2.0 * sigma12 + C2)
        denom = (mu1_sq + mu2_sq + C1) * (sigma1_sq + sigma2_sq + C2)
        ssim_map = numer / denom

        if need_mask:
            wi = jax.lax.broadcasted_iota(jnp.int32, (wo_pad, ho_pad), 0)
            hi = jax.lax.broadcasted_iota(jnp.int32, (wo_pad, ho_pad), 1)
            mask = ((wi < wo) & (hi < ho)).astype(jnp.float32)
            ssim_map = ssim_map * mask[None, :, :]

        # Per-image spatial mean as plain lane + sublane reductions
        # (no M=1 matvec through the MXU, no ones broadcast).
        col = jnp.sum(ssim_map, axis=-1, keepdims=True)        # (B, Wop, 1)
        means = jnp.sum(col, axis=-2, keepdims=True) * inv_hw  # (B, 1, 1)

        # Lane-dense per-image partial output; scalar reduction done in wrapper.
        out_ref[...] = jnp.broadcast_to(means, (b_blk, 1, 128))

    return kernel


def _pick_block_b(h_pad, w, wo_pad, ho_pad, in_itemsize, n_imgs,
                  vmem_budget_bytes, min_blocks):
    # Per-image peak working set (everything actually resident now that the
    # concat slab and the broadcast band matrix are gone):
    #   * x/y input blocks (native dtype, double-buffered)
    #   * f32 casts of x/y + one live product temp
    #   * pass-1 intermediate and its transpose
    #   * five filtered outputs + SSIM elementwise temps
    per_image = (4 * h_pad * w * in_itemsize
                 + 3 * h_pad * w * 4
                 + 2 * h_pad * wo_pad * 4
                 + 10 * wo_pad * ho_pad * 4)
    b = max(1, min(128, vmem_budget_bytes // per_image, n_imgs))
    if min_blocks > 1 and n_imgs >= min_blocks:
        # Keep at least `min_blocks` grid steps so the parallel axis can shard
        # across both TensorCores on v7x-class chips.
        b = min(b, max(1, n_imgs // min_blocks))
    n_blocks = -(-n_imgs // b)
    b = -(-n_imgs // n_blocks)        # rebalance so the last block is barely padded
    n_blocks = -(-n_imgs // b)
    return int(b), int(n_blocks)


def ssim_loss(x, y, win_size=WIN_SIZE, win_sigma=WIN_SIGMA):
    assert x.shape == y.shape, "inputs must be of same shape!"
    n, c, h, w = x.shape
    assert h >= win_size and w >= win_size
    ho = h - win_size + 1
    wo = w - win_size + 1

    # Padded geometry: H multiple of 8 so the batch-fold reshapes stay
    # view-only, Wo/Ho multiples of 128 so intermediates / ssim_map are
    # lane-dense (padded filter columns are zero and masked in the mean).
    h_pad = _round_up(h, 8)
    wo_pad = _round_up(wo, 128)
    ho_pad = _round_up(ho, 128)

    g = _gaussian_window(win_size, win_sigma)
    ah = _band_matrix(g, h, win_size)                        # (Ho, H)
    ah = jnp.pad(ah, ((0, ho_pad - ho), (0, h_pad - h)))     # zero-padded band
    aht = jnp.transpose(ah)                                  # (Hp, Hop)
    awt = jnp.transpose(_band_matrix(g, w, win_size))        # (W, Wo)
    awt = jnp.pad(awt, ((0, 0), (0, wo_pad - wo)))           # (W, Wop)

    n_imgs = n * c
    xf = x.reshape(n_imgs, h, w)                 # native dtype; cast in-kernel
    yf = y.reshape(n_imgs, h, w)
    if h_pad != h:
        xf = jnp.pad(xf, ((0, 0), (0, h_pad - h), (0, 0)))
        yf = jnp.pad(yf, ((0, 0), (0, h_pad - h), (0, 0)))

    itemsize = jnp.dtype(x.dtype).itemsize

    # Generation-aware VMEM sizing: v5e/v6e have 128 MiB physical VMEM and one
    # TensorCore; v7x has 64 MiB and two TCs (so prefer >=4 grid steps there).
    vmem_phys = _tpu_vmem_bytes()
    vmem_limit = min(int(0.75 * vmem_phys), 100 * 1024 * 1024)
    vmem_budget = int(0.55 * vmem_limit)
    min_blocks = 4 if vmem_phys <= 64 * 1024 * 1024 else 1

    b_blk, n_blocks = _pick_block_b(h_pad, w, wo_pad, ho_pad, itemsize, n_imgs,
                                    vmem_budget, min_blocks)
    n_pad = b_blk * n_blocks
    if n_pad != n_imgs:
        pad = n_pad - n_imgs
        xf = jnp.pad(xf, ((0, pad), (0, 0), (0, 0)))
        yf = jnp.pad(yf, ((0, pad), (0, 0), (0, 0)))

    # TODO(synk): for images larger than one MXU tile, exploit the 11-tap band
    # structure (block-band matmuls or pltpu.roll shifted FMAs) plus spatial
    # halo tiling; optionally run the filter matmuls in bf16 while keeping the
    # variance path in f32 (cancellation with data_range=255).

    flops_per_image = (2 * 5 * h_pad * w * wo_pad
                       + 2 * 5 * wo_pad * h_pad * ho_pad
                       + 22 * wo_pad * ho_pad)
    cost = pl.CostEstimate(
        flops=int(n_pad * flops_per_image),
        transcendentals=0,
        bytes_accessed=int(n_pad * (2 * h_pad * w * itemsize + 128 * 4)
                           + (awt.size + aht.size) * 4),
    )

    out = pl.pallas_call(
        _make_kernel(b_blk, h_pad, w, wo_pad, ho_pad, wo, ho),
        out_shape=jax.ShapeDtypeStruct((n_pad, 1, 128), jnp.float32),
        grid=(n_blocks,),
        in_specs=[
            pl.BlockSpec((b_blk, h_pad, w), lambda i: (i, 0, 0)),
            pl.BlockSpec((b_blk, h_pad, w), lambda i: (i, 0, 0)),
            pl.BlockSpec((w, wo_pad), lambda i: (0, 0)),
            pl.BlockSpec((h_pad, ho_pad), lambda i: (0, 0)),
        ],
        out_specs=pl.BlockSpec((b_blk, 1, 128), lambda i: (i, 0, 0)),
        compiler_params=pltpu.CompilerParams(
            dimension_semantics=("parallel",),      # independent per-block partials
            vmem_limit_bytes=int(vmem_limit),
        ),
        cost_estimate=cost,
    )(xf, yf, awt, aht)

    per_image_ssim = out[:n_imgs, 0, 0]            # drop padded dummy images
    return 1.0 - jnp.mean(per_image_ssim)


if __name__ == "__main__":
    key = jax.random.PRNGKey(0)
    kx, ky = jax.random.split(key)
    # NCHW, matches ssim_loss(channel=3) default
    x = jax.random.uniform(kx, (2, 3, 16, 16), dtype=jnp.float32)
    y = jax.random.uniform(ky, (2, 3, 16, 16), dtype=jnp.float32)

    loss = ssim_loss(x, y)
    jax.block_until_ready(loss)
    print("KERNEL_OK")
</pallas_src>

<mosaic_0001>
module attributes {stable_mosaic.version = 11 : i64} {
  func.func @kernel(%arg0: i32, %arg1: memref<1x16x16xf32, #tpu.memory_space<vmem>>, %arg2: memref<1x16x16xf32, #tpu.memory_space<vmem>>, %arg3: memref<16x128xf32, #tpu.memory_space<vmem>>, %arg4: memref<16x128xf32, #tpu.memory_space<vmem>>, %arg5: memref<1x1x128xf32, #tpu.memory_space<vmem>>) attributes {dimension_semantics = [#tpu.dimension_semantics<parallel>], iteration_bounds = array<i64: 6>, scalar_prefetch = 0 : i64, scratch_operands = 0 : i64, tpu.core_type = #tpu.core_type<tc>, window_params = [{transform_indices = @transform_0, window_bounds = array<i64: 1, 16, 16>}, {transform_indices = @transform_1, window_bounds = array<i64: 1, 16, 16>}, {pipeline_mode = #tpu.pipeline_mode<synchronous>, transform_indices = @transform_2, window_bounds = array<i64: 16, 128>}, {pipeline_mode = #tpu.pipeline_mode<synchronous>, transform_indices = @transform_3, window_bounds = array<i64: 16, 128>}, {transform_indices = @transform_4, window_bounds = array<i64: 1, 1, 128>}]} {
    %c0 = arith.constant 0 : index
    %c0_0 = arith.constant 0 : index
    %c0_1 = arith.constant 0 : index
    %0 = vector.load %arg1[%c0, %c0_0, %c0_1] : memref<1x16x16xf32, #tpu.memory_space<vmem>>, vector<1x16x16xf32>
    %c0_2 = arith.constant 0 : index
    %c0_3 = arith.constant 0 : index
    %c0_4 = arith.constant 0 : index
    %1 = vector.load %arg2[%c0_2, %c0_3, %c0_4] : memref<1x16x16xf32, #tpu.memory_space<vmem>>, vector<1x16x16xf32>
    %c0_5 = arith.constant 0 : index
    %c0_6 = arith.constant 0 : index
    %2 = vector.load %arg3[%c0_5, %c0_6] : memref<16x128xf32, #tpu.memory_space<vmem>>, vector<16x128xf32>
    %c0_7 = arith.constant 0 : index
    %c0_8 = arith.constant 0 : index
    %3 = vector.load %arg4[%c0_7, %c0_8] : memref<16x128xf32, #tpu.memory_space<vmem>>, vector<16x128xf32>
    %4 = vector.shape_cast %0 : vector<1x16x16xf32> to vector<16x16xf32>
    %cst = arith.constant dense<0.000000e+00> : vector<16x128xf32>
    %5 = tpu.matmul %4, %2, %cst {dimension_numbers = #tpu.dot_dimension_numbers<[1], [0], [0], [1], [0, 0, 1, 1], [], []>} : vector<16x16xf32>, vector<16x128xf32>, vector<16x128xf32> -> vector<16x128xf32>
    %6 = vector.shape_cast %5 : vector<16x128xf32> to vector<1x16x128xf32>
    %7 = tpu.transpose %6, [0, 2, 1] : vector<1x16x128xf32> -> vector<1x128x16xf32>
    %8 = vector.shape_cast %7 : vector<1x128x16xf32> to vector<128x16xf32>
    %cst_9 = arith.constant dense<0.000000e+00> : vector<128x128xf32>
    %9 = tpu.matmul %8, %3, %cst_9 {dimension_numbers = #tpu.dot_dimension_numbers<[1], [0], [0], [1], [0, 0, 1, 1], [], []>} : vector<128x16xf32>, vector<16x128xf32>, vector<128x128xf32> -> vector<128x128xf32>
    %10 = vector.shape_cast %9 : vector<128x128xf32> to vector<1x128x128xf32>
    %11 = vector.shape_cast %1 : vector<1x16x16xf32> to vector<16x16xf32>
    %cst_10 = arith.constant dense<0.000000e+00> : vector<16x128xf32>
    %12 = tpu.matmul %11, %2, %cst_10 {dimension_numbers = #tpu.dot_dimension_numbers<[1], [0], [0], [1], [0, 0, 1, 1], [], []>} : vector<16x16xf32>, vector<16x128xf32>, vector<16x128xf32> -> vector<16x128xf32>
    %13 = vector.shape_cast %12 : vector<16x128xf32> to vector<1x16x128xf32>
    %14 = tpu.transpose %13, [0, 2, 1] : vector<1x16x128xf32> -> vector<1x128x16xf32>
    %15 = vector.shape_cast %14 : vector<1x128x16xf32> to vector<128x16xf32>
    %cst_11 = arith.constant dense<0.000000e+00> : vector<128x128xf32>
    %16 = tpu.matmul %15, %3, %cst_11 {dimension_numbers = #tpu.dot_dimension_numbers<[1], [0], [0], [1], [0, 0, 1, 1], [], []>} : vector<128x16xf32>, vector<16x128xf32>, vector<128x128xf32> -> vector<128x128xf32>
    %17 = vector.shape_cast %16 : vector<128x128xf32> to vector<1x128x128xf32>
    %18 = arith.mulf %0, %0 : vector<1x16x16xf32>
    %19 = vector.shape_cast %18 : vector<1x16x16xf32> to vector<16x16xf32>
    %cst_12 = arith.constant dense<0.000000e+00> : vector<16x128xf32>
    %20 = tpu.matmul %19, %2, %cst_12 {dimension_numbers = #tpu.dot_dimension_numbers<[1], [0], [0], [1], [0, 0, 1, 1], [], []>} : vector<16x16xf32>, vector<16x128xf32>, vector<16x128xf32> -> vector<16x128xf32>
    %21 = vector.shape_cast %20 : vector<16x128xf32> to vector<1x16x128xf32>
    %22 = tpu.transpose %21, [0, 2, 1] : vector<1x16x128xf32> -> vector<1x128x16xf32>
    %23 = vector.shape_cast %22 : vector<1x128x16xf32> to vector<128x16xf32>
    %cst_13 = arith.constant dense<0.000000e+00> : vector<128x128xf32>
    %24 = tpu.matmul %23, %3, %cst_13 {dimension_numbers = #tpu.dot_dimension_numbers<[1], [0], [0], [1], [0, 0, 1, 1], [], []>} : vector<128x16xf32>, vector<16x128xf32>, vector<128x128xf32> -> vector<128x128xf32>
    %25 = vector.shape_cast %24 : vector<128x128xf32> to vector<1x128x128xf32>
    %26 = arith.mulf %1, %1 : vector<1x16x16xf32>
    %27 = vector.shape_cast %26 : vector<1x16x16xf32> to vector<16x16xf32>
    %cst_14 = arith.constant dense<0.000000e+00> : vector<16x128xf32>
    %28 = tpu.matmul %27, %2, %cst_14 {dimension_numbers = #tpu.dot_dimension_numbers<[1], [0], [0], [1], [0, 0, 1, 1], [], []>} : vector<16x16xf32>, vector<16x128xf32>, vector<16x128xf32> -> vector<16x128xf32>
    %29 = vector.shape_cast %28 : vector<16x128xf32> to vector<1x16x128xf32>
    %30 = tpu.transpose %29, [0, 2, 1] : vector<1x16x128xf32> -> vector<1x128x16xf32>
    %31 = vector.shape_cast %30 : vector<1x128x16xf32> to vector<128x16xf32>
    %cst_15 = arith.constant dense<0.000000e+00> : vector<128x128xf32>
    %32 = tpu.matmul %31, %3, %cst_15 {dimension_numbers = #tpu.dot_dimension_numbers<[1], [0], [0], [1], [0, 0, 1, 1], [], []>} : vector<128x16xf32>, vector<16x128xf32>, vector<128x128xf32> -> vector<128x128xf32>
    %33 = vector.shape_cast %32 : vector<128x128xf32> to vector<1x128x128xf32>
    %34 = arith.mulf %0, %1 : vector<1x16x16xf32>
    %35 = vector.shape_cast %34 : vector<1x16x16xf32> to vector<16x16xf32>
    %cst_16 = arith.constant dense<0.000000e+00> : vector<16x128xf32>
    %36 = tpu.matmul %35, %2, %cst_16 {dimension_numbers = #tpu.dot_dimension_numbers<[1], [0], [0], [1], [0, 0, 1, 1], [], []>} : vector<16x16xf32>, vector<16x128xf32>, vector<16x128xf32> -> vector<16x128xf32>
    %37 = vector.shape_cast %36 : vector<16x128xf32> to vector<1x16x128xf32>
    %38 = tpu.transpose %37, [0, 2, 1] : vector<1x16x128xf32> -> vector<1x128x16xf32>
    %39 = vector.shape_cast %38 : vector<1x128x16xf32> to vector<128x16xf32>
    %cst_17 = arith.constant dense<0.000000e+00> : vector<128x128xf32>
    %40 = tpu.matmul %39, %3, %cst_17 {dimension_numbers = #tpu.dot_dimension_numbers<[1], [0], [0], [1], [0, 0, 1, 1], [], []>} : vector<128x16xf32>, vector<16x128xf32>, vector<128x128xf32> -> vector<128x128xf32>
    %41 = vector.shape_cast %40 : vector<128x128xf32> to vector<1x128x128xf32>
    %42 = arith.mulf %10, %10 : vector<1x128x128xf32>
    %43 = arith.mulf %17, %17 : vector<1x128x128xf32>
    %44 = arith.mulf %10, %17 : vector<1x128x128xf32>
    %45 = arith.subf %25, %42 : vector<1x128x128xf32>
    %46 = arith.subf %33, %43 : vector<1x128x128xf32>
    %47 = arith.subf %41, %44 : vector<1x128x128xf32>
    %cst_18 = arith.constant 2.000000e+00 : f32
    %48 = vector.broadcast %cst_18 : f32 to vector<1x128x128xf32>
    %49 = arith.mulf %48, %44 : vector<1x128x128xf32>
    %cst_19 = arith.constant 6.502500e+00 : f32
    %50 = vector.broadcast %cst_19 : f32 to vector<1x128x128xf32>
    %51 = arith.addf %49, %50 : vector<1x128x128xf32>
    %cst_20 = arith.constant 2.000000e+00 : f32
    %52 = vector.broadcast %cst_20 : f32 to vector<1x128x128xf32>
    %53 = arith.mulf %52, %47 : vector<1x128x128xf32>
    %cst_21 = arith.constant 5.852250e+01 : f32
    %54 = vector.broadcast %cst_21 : f32 to vector<1x128x128xf32>
    %55 = arith.addf %53, %54 : vector<1x128x128xf32>
    %56 = arith.mulf %51, %55 : vector<1x128x128xf32>
    %57 = arith.addf %42, %43 : vector<1x128x128xf32>
    %cst_22 = arith.constant 6.502500e+00 : f32
    %58 = vector.broadcast %cst_22 : f32 to vector<1x128x128xf32>
    %59 = arith.addf %57, %58 : vector<1x128x128xf32>
    %60 = arith.addf %45, %46 : vector<1x128x128xf32>
    %cst_23 = arith.constant 5.852250e+01 : f32
    %61 = vector.broadcast %cst_23 : f32 to vector<1x128x128xf32>
    %62 = arith.addf %60, %61 : vector<1x128x128xf32>
    %63 = arith.mulf %59, %62 : vector<1x128x128xf32>
    %64 = arith.divf %56, %63 : vector<1x128x128xf32>
    %65 = tpu.iota {dimensions = array<i32: 0>} : vector<128x128xi32>
    %66 = tpu.iota {dimensions = array<i32: 1>} : vector<128x128xi32>
    %c6_i32 = arith.constant 6 : i32
    %67 = vector.broadcast %c6_i32 : i32 to vector<128x128xi32>
    %68 = arith.cmpi slt, %65, %67 : vector<128x128xi32>
    %c6_i32_24 = arith.constant 6 : i32
    %69 = vector.broadcast %c6_i32_24 : i32 to vector<128x128xi32>
    %70 = arith.cmpi slt, %66, %69 : vector<128x128xi32>
    %71 = arith.andi %68, %70 : vector<128x128xi1>
    %72 = arith.extui %71 : vector<128x128xi1> to vector<128x128xi32>
    %73 = arith.sitofp %72 : vector<128x128xi32> to vector<128x128xf32>
    %74 = vector.shape_cast %73 : vector<128x128xf32> to vector<1x128x128xf32>
    %75 = arith.mulf %64, %74 : vector<1x128x128xf32>
    %cst_25 = arith.constant dense<0.000000e+00> : vector<1x128xf32>
    %76 = vector.multi_reduction <add>, %75, %cst_25 [2] : vector<1x128x128xf32> to vector<1x128xf32>
    %77 = vector.shape_cast %76 : vector<1x128xf32> to vector<1x128x1xf32>
    %cst_26 = arith.constant dense<0.000000e+00> : vector<1x1xf32>
    %78 = vector.multi_reduction <add>, %77, %cst_26 [1] : vector<1x128x1xf32> to vector<1x1xf32>
    %79 = vector.shape_cast %78 : vector<1x1xf32> to vector<1x1x1xf32>
    %cst_27 = arith.constant 0.027777778 : f32
    %80 = vector.broadcast %cst_27 : f32 to vector<1x1x1xf32>
    %81 = arith.mulf %79, %80 : vector<1x1x1xf32>
    %82 = vector.shape_cast %81 : vector<1x1x1xf32> to vector<1x1x1xf32>
    %83 = vector.broadcast %82 : vector<1x1x1xf32> to vector<1x1x128xf32>
    %c0_28 = arith.constant 0 : index
    %c0_29 = arith.constant 0 : index
    %c0_30 = arith.constant 0 : index
    %84 = vector.load %arg5[%c0_28, %c0_29, %c0_30] : memref<1x1x128xf32, #tpu.memory_space<vmem>>, vector<1x1x128xf32>
    tpu.vector_store %arg5[%c0_28, %c0_29, %c0_30], %83 {strides = array<i32>} : memref<1x1x128xf32, #tpu.memory_space<vmem>>, vector<1x1x128xf32>,
    return
  }
  func.func @transform_0(%arg0: i32) -> (i32, i32, i32) {
    %c0_i32 = arith.constant 0 : i32
    %c0_i32_0 = arith.constant 0 : i32
    %c0_i32_1 = arith.constant 0 : i32
    return %arg0, %c0_i32, %c0_i32_0 : i32, i32, i32
  }
  func.func @transform_1(%arg0: i32) -> (i32, i32, i32) {
    %c0_i32 = arith.constant 0 : i32
    %c0_i32_0 = arith.constant 0 : i32
    %c0_i32_1 = arith.constant 0 : i32
    return %arg0, %c0_i32, %c0_i32_0 : i32, i32, i32
  }
  func.func @transform_2(%arg0: i32) -> (i32, i32) {
    %c0_i32 = arith.constant 0 : i32
    %c0_i32_0 = arith.constant 0 : i32
    %c0_i32_1 = arith.constant 0 : i32
    return %c0_i32, %c0_i32_0 : i32, i32
  }
  func.func @transform_3(%arg0: i32) -> (i32, i32) {
    %c0_i32 = arith.constant 0 : i32
    %c0_i32_0 = arith.constant 0 : i32
    %c0_i32_1 = arith.constant 0 : i32
    return %c0_i32, %c0_i32_0 : i32, i32
  }
  func.func @transform_4(%arg0: i32) -> (i32, i32, i32) {
    %c0_i32 = arith.constant 0 : i32
    %c0_i32_0 = arith.constant 0 : i32
    %c0_i32_1 = arith.constant 0 : i32
    return %arg0, %c0_i32, %c0_i32_0 : i32, i32, i32
  }
}

</mosaic_0001>

<bundles_post_ra>
// kernel: tpu_custom_call.1
= control target key start
LH: loop header
LB: loop body
LE: loop exit
PB: predicated region body
PF: predicated region fallthrough
CT: control target
= control target key end

     0   :  { %s3213_s0 = inlined_call_operand.hbm [shape: f32[6,16,16], index: 0, kind: input, shape index: {}]   ;;  %s3214_s1 = inlined_call_operand.hbm [shape: f32[6,16,16], index: 1, kind: input, shape index: {}]   ;;  %s3215_s2 = inlined_call_operand.hbm [shape: f32[16,128], index: 2, kind: input, shape index: {}]   ;;  %s3216_s3 = inlined_call_operand.hbm [shape: f32[16,128], index: 3, kind: input, shape index: {}]   ;;  %s3217_s4 = inlined_call_operand.hbm [shape: f32[6,1,128], index: 4, kind: output, shape index: {}]  }
   0x1   :  { %3226 = sst [smem:[#allocation20_spill]] %s3213_s0 }
   0x2   :  { %3227 = sst [smem:[#allocation21_spill]] %s3215_s2 }
   0x3   :  { %3228 = sst [smem:[#allocation22_spill]] %s3216_s3 }
   0x4   :  { %9 = vsyncpa [#allocation3], 0 }
   0x5   :  { %11 = vsyncpa [#allocation3 + $0x1], 0 }
   0x6   :  { %12 = vsyncpa [#allocation6], 0 }
   0x7   :  { %14 = vsyncpa [#allocation6 + $0x1], 0 }
   0x8   :  { %15 = vsyncpa [#allocation9], 0 }
   0x9   :  { %16 = vsyncpa [#allocation4], 0 }
   0xa   :  { %18 = vsyncpa [#allocation4 + $0x1], 0  ;;  %s2401_s15 = smov 0   ;;  %s2403_s16 = smov 0  }
   0xb   :  { %s2405_s17 = smov 0   ;;  %s2407_s18 = smov 0  }
   0xc LB: > { %s2422_s19 = sadd.s32 4294967295, %s2369_s18   ;;  %s1949_s20 = sadd.s32 4294967294, %s2369_s18   ;;  %s2369_s18 = sphi %s2407_s18, %s3272_s18   ;;  %s2365_s17 = sphi %s2405_s17, %s3271_s17   ;;  %s2361_s16 = sphi %s2403_s16, %s3270_s16   ;;  %s2357_s15 = sphi %s2401_s15, %s3269_s15  }
   0xd   : > { %p44_p0 = scmp.ne.s32.totalorder %s2361_s16, %s2357_s15  ;;  %p45_p1 = scmp.eq.s32.totalorder %s2422_s19, 0 }
   0xe   : > { %p136_p2 = scmp.eq.s32.totalorder %s2422_s19, 5  ;;  %p142_p3 = scmp.eq.s32.totalorder %s1949_s20, 5 }
   0xf   : > { %p2431_p4 = por %p45_p1, %p44_p0  ;;  %p1950_p5 = scmp.ge.s32.totalorder %s2369_s18, 1 }
  0x10   : > { %p2436_p6 = por %p142_p3, %p44_p0  ;;  %p149_p7 = scmp.lt.s32.totalorder %s2369_s18, 7 }
  0x11   : > { %s3231_s2 = sld [smem:[#allocation21_spill]]  ;;  %s2371_s27 = smov [#allocation7]  }
  0x12   : > { %p2444_p8 = pnand %p1950_p5, %p149_p7  ;;  %s162_s28 = sshll.u32 %s2371_s27, 4  ;;  %s163_s28 = int_to_ptr.vmem [resolvable:$true] %s162_s28 }
  0x13   : > { %s3233_s3 = sld [smem:[#allocation22_spill]]  ;;  %s3218_s6 = smov 128  }
  0x14   : > { %p2078_p9 = pneg %p2444_p8  ;;  %s3220_s7 = smov 8  }
  0x15   : > { %s2374_s8 = smov [#allocation8]   ;;  %s2462_s10 = sadd.s32 1, %s2369_s18  }
  0x16   : > { %p2079_p10 = pnand %p2078_p9, %p45_p1  ;;  %s176_s9 = sshll.u32 %s2374_s8, 4  ;;  %s177_s9 = int_to_ptr.vmem [resolvable:$true] %s176_s9 }
  0x17   : > { %s160_s25 = sshll.u32 %s3231_s2, 4  ;;  %s31_s11 = sadd.s32 1, %s2365_s17  ;;  %s161_s25 = int_to_ptr.hbm [resolvable:$true] %s160_s25 }
  0x18   : > { %2081 = dma.hbm_to_vmem [thread:$0]  (!%p2079_p10), %s161_s25, 256, %s163_s28, [#allocation6], %s3218_s6, %s3218_s6, %s3220_s7  }
  0x19   : > { %s174_s5 = sshll.u32 %s3233_s3, 4  ;;  %s28_s12 = ssub.s32 %s2369_s18, %s2462_s10  ;;  %s175_s5 = int_to_ptr.hbm [resolvable:$true] %s174_s5 }
  0x1a   : > { %2084 = dma.hbm_to_vmem [thread:$0]  (!%p2079_p10), %s175_s5, 256, %s177_s9, [#allocation9], %s3218_s6, %s3218_s6, %s3220_s7  }
  0x1b   : > { %p38_p11 = scmp.ne.s32.totalorder %s2365_s17, %s2361_s16  ;;  %p29_p12 = scmp.eq.s32.totalorder %s28_s12, 0 }
  0x1c   : > { %p39_p13 = scmp.eq.s32.totalorder %s2369_s18, 0  ;;  %p2098_p3 = scmp.lt.s32.totalorder %s2369_s18, 6 }
  0x1d   : > { %p2472_p0 = por %p136_p2, %p38_p11  ;;  %s190_s20 = sand.u32 1, %s2365_s17  }
  0x1e   : > { %s2478_s14 = scalar_select %p29_p12, %s2365_s17, %s31_s11  }
  0x1f   : > { %p40_p5 = por %p39_p13, %p38_p11  ;;  %s2481_s23 = sshll.u32 %s190_s20, 4 }
  0x20   : > { %s2058_s24 = sshll.u32 %s2369_s18, 4  ;;  %s3235_s0 = sld [smem:[#allocation20_spill]] }
  0x21   : > { %s194_s29 = scalar_lea.vmem [#allocation2], %s2481_s23  ;;  %p2488_p2 = pnand %p2098_p3, %p40_p5 }
  0x22   : > { %s202_s30 = sshll.u32 %s194_s29, 4  ;;  %s221_s12 = scalar_lea.hbm %s3214_s1, %s2058_s24  ;;  %s203_s30 = int_to_ptr.vmem [resolvable:$true] %s202_s30 }
  0x23   : > { %s222_s6 = sshll.u32 %s221_s12, 4  ;;  %s191_s7 = scalar_lea.sflag [#allocation3], %s190_s20  ;;  %s223_s6 = int_to_ptr.hbm [resolvable:$true] %s222_s6 }
  0x24   : > { %p2235_p9 = pneg %p2488_p2 }
  0x26   : > { %s199_s28 = scalar_lea.hbm %s3235_s0, %s2058_s24  ;;  %s2238_s29 = scalar_lea.hbm %s3235_s0, 96 }
  0x27   : > { %s200_s5 = sshll.u32 %s199_s28, 4  ;;  %s201_s5 = int_to_ptr.hbm [resolvable:$true] %s200_s5 }
  0x28   : > { %s2231_s2 = sshra.s32 %s201_s5, 4  ;;  %s2232_s2 = int_to_ptr.hbm [resolvable:$true] %s2231_s2 }
  0x29   : > { %s2233_s25 = scalar_lea.hbm %s2232_s2, 16  ;;  %p2239_p12 = scmp.lt.s32.totalorder %s2232_s2, %s3235_s0 }
  0x2a   : > { %p2234_p7 = scmp.ne.s32.totalorder %s2232_s2, %s2233_s25  ;;  %p2240_p13 = scmp.lt.s32.totalorder %s2238_s29, %s2233_s25 }
  0x2c   : > { %p2236_p10 = pnand %p2235_p9, %p2234_p7  ;;  %p2241_p3 = por %p2240_p13, %p2239_p12 }
  0x2e   : > { %p2237_p11 = pneg %p2236_p10 }
  0x30   : > { %p2242_p5 = pnand %p2241_p3, %p2237_p11 }
  0x32   : > { %2245 = shalt.err (!%p2242_p5)
}
  0x33   : > { %s3237_s20 = smov 8   ;;  %s3238_s24 = smov 128  }
  0x34   : > { %2088 = dma.hbm_to_vmem [thread:$0]  (!%p2488_p2), %s201_s5, 256, %s203_s30, %s191_s7, %s3238_s24, %s3238_s24, %s3237_s20  }
  0x35   : > { %s216_s12 = scalar_lea.vmem [#allocation5], %s2481_s23  ;;  %s212_s28 = sand.u32 1, %s2369_s18  }
  0x36   : > { %s224_s27 = sshll.u32 %s216_s12, 4  ;;  %s213_s9 = scalar_lea.sflag [#allocation6], %s212_s28  ;;  %s225_s27 = int_to_ptr.vmem [resolvable:$true] %s224_s27 }
  0x37   : > { %s2261_s2 = sshra.s32 %s223_s6, 4  ;;  %s2268_s0 = scalar_lea.hbm %s3214_s1, 96  ;;  %s2262_s2 = int_to_ptr.hbm [resolvable:$true] %s2261_s2 }
  0x38   : > { %s2263_s25 = scalar_lea.hbm %s2262_s2, 16  ;;  %p2269_p12 = scmp.lt.s32.totalorder %s2262_s2, %s3214_s1 }
  0x39   : > { %p2264_p7 = scmp.ne.s32.totalorder %s2262_s2, %s2263_s25  ;;  %p2270_p13 = scmp.lt.s32.totalorder %s2268_s0, %s2263_s25 }
  0x3b   : > { %p2266_p10 = pnand %p2264_p7, %p2235_p9  ;;  %p2271_p3 = por %p2270_p13, %p2269_p12 }
  0x3d   : > { %p2267_p11 = pneg %p2266_p10 }
  0x3f   : > { %p2272_p5 = pnand %p2271_p3, %p2267_p11 }
  0x41   : > { %2275 = shalt.err (!%p2272_p5)
}
  0x42   : > { %2091 = dma.hbm_to_vmem [thread:$0]  (!%p2488_p2), %s223_s6, 256, %s225_s27, %s213_s9, %s3238_s24, %s3238_s24, %s3237_s20  }
  0x43   : > { %236 = sbr.rel (%p2444_p8) target bundleno = 1565 (0x61d), region = 36 }
  0x48   : > { %s2530_s23 = sand.u32 1, %s2361_s16  }
  0x49   : > { %s1961_s3 = sshll.u32 %s2530_s23, 4  ;;  %s239_s0 = scalar_lea.sflag [#allocation3], %s2530_s23 }
  0x4a   : > { %s242_s30 = scalar_lea.vmem [#allocation2], %s1961_s3 }
  0x4b   : > { %2336 = dma.done.wait (%p2431_p4), %s239_s0, 256  }
  0x4c   : > { %2338 = vsyncadd (%p2431_p4), %s239_s0, 4294967040  ;;  %s248_s6 = sand.u32 1, %s2422_s19   ;;  %s2539_s26 = scalar_lea.vmem [#allocation5], %s1961_s3 }
  0x4d   : > { %s249_s5 = scalar_lea.sflag [#allocation6], %s248_s6 }
  0x4e   : > { %2340 = dma.done.wait (%p2431_p4), %s249_s5, 256  }
  0x4f   : > { %2342 = vsyncadd (%p2431_p4), %s249_s5, 4294967040 }
  0x50   : > { %2344 = dma.done.wait (%p45_p1), [#allocation6], 256  }
  0x51   : > { %2346 = vsyncadd (%p45_p1), [#allocation6], 4294967040 }
  0x52   : > { %2348 = dma.done.wait (%p45_p1), [#allocation9], 256  }
  0x53   : > { %2350 = vsyncadd (%p45_p1), [#allocation9], 4294967040  ;;  %v297_v0 = vld [vmem:[#allocation7 + $0x8] sm:$0xff]  ;;  %v296_v1 = vld [vmem:[#allocation7] sm:$0xff]  ;;  %vm300_vm0 = vcmask 130048   ;;  %s1837_s20 = scalar_lea.hbm %s3217_s4, %s2422_s19  ;;  %s291_s24 = scalar_lea.vmem [#allocation10], %s2530_s23 }
  0x54   : > { %321 = vmatpush.msra.mxu0 %v297_v0  ;;  %v2553_v2 = vld [vmem:[%s242_s30] sm:$0xff]  ;;  %v2557_v3 = vld [vmem:[%s242_s30 + $0x8] sm:$0xff]  ;;  %s1839_s12 = sshll.u32 %s291_s24, 4  ;;  %s1841_s27 = sshll.u32 %s1837_s20, 4  ;;  %s1840_s12 = int_to_ptr.vmem [resolvable:$true] %s1839_s12  ;;  %s1842_s27 = int_to_ptr.hbm [resolvable:$true] %s1841_s27 }
  0x55   : > { %v649_v4 = vmul.f32 %v2553_v2, %v2553_v2  ;;  %v650_v5 = vmul.f32 %v2557_v3, %v2557_v3  ;;  %v299_v6 = vld [vmem:[#allocation8 + $0x8] sm:$0xff]  ;;  %v298_v10 = vld [vmem:[#allocation8] sm:$0xff]  ;;  %s1829_s28 = scalar_lea.sflag [#allocation4], %s2530_s23  ;;  %s2305_s9 = sshra.s32 %s1842_s27, 4  ;;  %s2306_s9 = int_to_ptr.hbm [resolvable:$true] %s2305_s9 }
  0x56   : > { %322 = vmatpush.msra.mxu0 %v296_v1  ;;  %424 = vmatpush.msra.mxu1 %v299_v6  ;;  %v2580_v25 = vld [vmem:[%s2539_s26] sm:$0xff]  ;;  %v2588_v28 = vld [vmem:[%s2539_s26 + $0x8] sm:$0xff]  ;;  %s2307_s2 = scalar_lea.hbm %s2306_s9, 1  ;;  %s2311_s19 = scalar_lea.hbm %s3217_s4, 6 }
  0x57   : > { %1965 = vmatmul.msk.f32.vlgmr.msra.gmra.mxu0 %vm300_vm0, %v2553_v2  ;;  %2060 = vmatpush.msra.mxu2 %v299_v6  ;;  %v825_v26 = vmul.f32 %v2580_v25, %v2580_v25  ;;  %v826_v29 = vmul.f32 %v2588_v28, %v2588_v28  ;;  %p2308_p1 = scmp.ne.s32.totalorder %s2306_s9, %s2307_s2  ;;  %p2312_p2 = scmp.lt.s32.totalorder %s2306_s9, %s3217_s4 }
  0x58   : > { %671 = vmatpush.msrb.mxu0 %v297_v0  ;;  %2062 = vmatpush.msra.mxu3 %v299_v6  ;;  %p2313_p9 = scmp.lt.s32.totalorder %s2311_s19, %s2307_s2 }
  0x59   : > { %425 = vmatpush.msra.mxu1 %v298_v10  ;;  %2061 = vmatpush.msra.mxu2 %v298_v10  ;;  %p2309_p4 = pnand %p2308_p1, %p2472_p0 }
  0x5a   : > { %672 = vmatpush.msrb.mxu0 %v296_v1  ;;  %2063 = vmatpush.msra.mxu3 %v298_v10  ;;  %p2314_p7 = por %p2313_p9, %p2312_p2 }
  0x5b   : > { %495 = vmatpush.msrb.mxu2 %v297_v0  ;;  %598 = vmatpush.msrb.mxu1 %v299_v6  ;;  %p2310_p8 = pneg %p2309_p4 }
  0x5c   : > { %847 = vmatpush.msra.mxu0 %v297_v0  ;;  %1126 = vmatpush.msrb.mxu3 %v299_v6 }
  0x5d   : > { %496 = vmatpush.msrb.mxu2 %v296_v1  ;;  %599 = vmatpush.msrb.mxu1 %v298_v10  ;;  %p2315_p10 = pnand %p2314_p7, %p2310_p8 }
  0x5e   : > { %848 = vmatpush.msra.mxu0 %v296_v1  ;;  %1127 = vmatpush.msrb.mxu3 %v298_v10 }
  0x5f   : > { %1966 = vmatmul.msk.f32.gmra.mxu0 %vm300_vm0, %v2557_v3 }
  0x67   : > { %2001 = vmatmul.msk.f32.vlgmr.msrb.gmra.mxu0 %vm300_vm0, %v649_v4 }
  0x68   : > { %950 = vmatpush.msrb.mxu0 %v299_v6 }
  0x6a   : > { %951 = vmatpush.msrb.mxu0 %v298_v10 }
  0x6f   : > { %2002 = vmatmul.msk.f32.gmra.mxu0 %vm300_vm0, %v650_v5 }
  0x77   : > { %2019 = vmatmul.msk.f32.vlgmr.msra.gmra.mxu0 %vm300_vm0, %v825_v26 }
  0x7f   : > { %2020 = vmatmul.msk.f32.gmra.mxu0 %vm300_vm0, %v826_v29 }
  0xd4   : > { %v324_v7 = vpop.f32.mrf.mxu0 }
  0xd5   : > { %330 = vxpose.xlu0.b32.start [1/2] (short) %v324_v7, 128 }
  0xdc   : > { %v327_v8 = vpop.f32.mrf.mxu0 }
  0xdd   : > { %331 = vxpose.xlu0.b32.end [2/2] (short) %v327_v8, 128 }
  0xe4   : > { %v674_v9 = vpop.f32.mrf.mxu0 }
  0xe5   : > { %680 = vxpose.xlu2.b32.start [1/2] (short) %v674_v9, 128 }
  0xec   : > { %v677_v11 = vpop.f32.mrf.mxu0 }
  0xed   : > { %681 = vxpose.xlu2.b32.end [2/2] (short) %v677_v11, 128 }
  0xf4   : > { %v850_v45 = vpop.f32.mrf.mxu0 }
  0xfc   : > { %v853_v48 = vpop.f32.mrf.mxu0 }
 0x155   : > { %856 = vxpose.xlu0.b32.start [1/2] (short) %v850_v45, 128 }
 0x15d   : > { %857 = vxpose.xlu0.b32.end [2/2] (short) %v853_v48, 128 }
 0x179   : > { %v346_v12 = vpop.trf.xlu0 }
 0x17a   : > { %1967 = vmatmul.msk.f32.vlgmr.msra.gmra.mxu1 %vm300_vm0, %v346_v12 }
 0x17b   : > { %1023 = vmatpush.msra.mxu1 %v297_v0 }
 0x17d   : > { %1024 = vmatpush.msra.mxu1 %v296_v1 }
 0x17e   : > { %v696_v31 = vpop.trf.xlu2 }
 0x181   : > { %v347_v13 = vpop.trf.xlu0 }
 0x182   : > { %1968 = vmatmul.msk.f32.gmra.mxu1 %vm300_vm0, %v347_v13 }
 0x186   : > { %v697_v33 = vpop.trf.xlu2 }
 0x189   : > { %v348_v14 = vpop.trf.xlu0 }
 0x18a   : > { %1969 = vmatmul.msk.f32.gmra.mxu1 %vm300_vm0, %v348_v14 }
 0x18e   : > { %v698_v34 = vpop.trf.xlu2 }
 0x191   : > { %v349_v15 = vpop.trf.xlu0 }
 0x192   : > { %1970 = vmatmul.msk.f32.gmra.mxu1 %vm300_vm0, %v349_v15 }
 0x196   : > { %v699_v35 = vpop.trf.xlu2 }
 0x199   : > { %v350_v16 = vpop.trf.xlu0 }
 0x19a   : > { %1971 = vmatmul.msk.f32.gmra.mxu1 %vm300_vm0, %v350_v16 }
 0x19e   : > { %v700_v36 = vpop.trf.xlu2 }
 0x1a1   : > { %v351_v17 = vpop.trf.xlu0 }
 0x1a2   : > { %1972 = vmatmul.msk.f32.gmra.mxu1 %vm300_vm0, %v351_v17 }
 0x1a6   : > { %v701_v37 = vpop.trf.xlu2 }
 0x1a9   : > { %v352_v18 = vpop.trf.xlu0 }
 0x1aa   : > { %1973 = vmatmul.msk.f32.gmra.mxu1 %vm300_vm0, %v352_v18 }
 0x1ae   : > { %v702_v38 = vpop.trf.xlu2 }
 0x1b1   : > { %v353_v19 = vpop.trf.xlu0 }
 0x1b2   : > { %1974 = vmatmul.msk.f32.gmra.mxu1 %vm300_vm0, %v353_v19 }
 0x1b6   : > { %v703_v39 = vpop.trf.xlu2 }
 0x1b9   : > { %v354_v20 = vpop.trf.xlu0 }
 0x1ba   : > { %1975 = vmatmul.msk.f32.gmra.mxu1 %vm300_vm0, %v354_v20 }
 0x1be   : > { %v704_v40 = vpop.trf.xlu2 }
 0x1c1   : > { %v355_v21 = vpop.trf.xlu0 }
 0x1c2   : > { %1976 = vmatmul.msk.f32.gmra.mxu1 %vm300_vm0, %v355_v21 }
 0x1c6   : > { %v705_v41 = vpop.trf.xlu2 }
 0x1c9   : > { %v356_v22 = vpop.trf.xlu0 }
 0x1ca   : > { %1977 = vmatmul.msk.f32.gmra.mxu1 %vm300_vm0, %v356_v22  ;;  %v1001_v22 = vmul.f32 %v2580_v25, %v2553_v2 }
 0x1ce   : > { %v706_v42 = vpop.trf.xlu2 }
 0x1d1   : > { %v357_v23 = vpop.trf.xlu0 }
 0x1d2   : > { %1978 = vmatmul.msk.f32.gmra.mxu1 %vm300_vm0, %v357_v23 }
 0x1d6   : > { %v707_v43 = vpop.trf.xlu2 }
 0x1d9   : > { %v358_v24 = vpop.trf.xlu0 }
 0x1da   : > { %1979 = vmatmul.msk.f32.vlgmr.msra.gmra.mxu2 %vm300_vm0, %v358_v24 }
 0x1db   : > { %774 = vmatpush.msra.mxu2 %v299_v6 }
 0x1dd   : > { %775 = vmatpush.msra.mxu2 %v298_v10 }
 0x1de   : > { %v708_v46 = vpop.trf.xlu2 }
 0x1e1   : > { %v359_v27 = vpop.trf.xlu0 }
 0x1e2   : > { %1980 = vmatmul.msk.f32.gmra.mxu2 %vm300_vm0, %v359_v27  ;;  %v1002_v27 = vmul.f32 %v2588_v28, %v2557_v3 }
 0x1e6   : > { %v709_v49 = vpop.trf.xlu2 }
 0x1e9   : > { %v360_v30 = vpop.trf.xlu0 }
 0x1ea   : > { %1981 = vmatmul.msk.f32.gmra.mxu2 %vm300_vm0, %v360_v30 }
 0x1ee   : > { %v710_v52 = vpop.trf.xlu2 }
 0x1f1   : > { %v361_v32 = vpop.trf.xlu0 }
 0x1f2   : > { %1982 = vmatmul.msk.f32.gmra.mxu2 %vm300_vm0, %v361_v32 }
 0x1f6   : > { %v711_v54 = vpop.trf.xlu2 }
 0x1f7   : > { %v2629_v62 = vpop.f32.mrf.mxu1 }
 0x1f9   : > { %v872_v56 = vpop.trf.xlu0 }
 0x1fa   : > { %1983 = vmatmul.msk.f32.vlgmr.msrb.gmra.mxu2 %vm300_vm0, %v2580_v25  ;;  %2021 = vmatmul.msk.f32.vlgmr.msrb.gmra.mxu0 %vm300_vm0, %v872_v56 }
 0x1ff   : > { %v2633_v4 = vpop.f32.mrf.mxu1 }
 0x201   : > { %v873_v57 = vpop.trf.xlu0 }
 0x202   : > { %1984 = vmatmul.msk.f32.gmra.mxu2 %vm300_vm0, %v2588_v28  ;;  %2022 = vmatmul.msk.f32.gmra.mxu0 %vm300_vm0, %v873_v57 }
 0x207   : > { %v2638_v8 = vpop.f32.mrf.mxu1 }
 0x209   : > { %v874_v58 = vpop.trf.xlu0 }
 0x20a   : > { %2003 = vmatmul.msk.f32.vlgmr.msra.gmra.mxu2 %vm300_vm0, %v696_v31  ;;  %2023 = vmatmul.msk.f32.gmra.mxu0 %vm300_vm0, %v874_v58 }
 0x20f   : > { %v2643_v11 = vpop.f32.mrf.mxu1 }
 0x211   : > { %v875_v59 = vpop.trf.xlu0 }
 0x212   : > { %2004 = vmatmul.msk.f32.gmra.mxu2 %vm300_vm0, %v697_v33  ;;  %2024 = vmatmul.msk.f32.gmra.mxu0 %vm300_vm0, %v875_v59 }
 0x217   : > { %v2646_v13 = vpop.f32.mrf.mxu1 }
 0x219   : > { %v876_v61 = vpop.trf.xlu0 }
 0x21a   : > { %2005 = vmatmul.msk.f32.gmra.mxu2 %vm300_vm0, %v698_v34  ;;  %2025 = vmatmul.msk.f32.gmra.mxu0 %vm300_vm0, %v876_v61 }
 0x21f   : > { %v2650_v18 = vpop.f32.mrf.mxu1 }
 0x221   : > { %v877_v0 = vpop.trf.xlu0 }
 0x222   : > { %2006 = vmatmul.msk.f32.gmra.mxu2 %vm300_vm0, %v699_v35  ;;  %2026 = vmatmul.msk.f32.gmra.mxu0 %vm300_vm0, %v877_v0 }
 0x227   : > { %v2656_v21 = vpop.f32.mrf.mxu1 }
 0x229   : > { %v878_v5 = vpop.trf.xlu0 }
 0x22a   : > { %2007 = vmatmul.msk.f32.gmra.mxu2 %vm300_vm0, %v700_v36  ;;  %2027 = vmatmul.msk.f32.gmra.mxu0 %vm300_vm0, %v878_v5 }
 0x22f   : > { %v2663_v26 = vpop.f32.mrf.mxu1 }
 0x231   : > { %v879_v7 = vpop.trf.xlu0 }
 0x232   : > { %2008 = vmatmul.msk.f32.gmra.mxu2 %vm300_vm0, %v701_v37  ;;  %2028 = vmatmul.msk.f32.gmra.mxu0 %vm300_vm0, %v879_v7 }
 0x237   : > { %v2670_v2 = vpop.f32.mrf.mxu1 }
 0x239   : > { %v880_v10 = vpop.trf.xlu0 }
 0x23a   : > { %2009 = vmatmul.msk.f32.gmra.mxu2 %vm300_vm0, %v702_v38  ;;  %2029 = vmatmul.msk.f32.gmra.mxu0 %vm300_vm0, %v880_v10 }
 0x23f   : > { %v2675_v28 = vpop.f32.mrf.mxu1 }
 0x241   : > { %v881_v15 = vpop.trf.xlu0 }
 0x242   : > { %2010 = vmatmul.msk.f32.gmra.mxu2 %vm300_vm0, %v703_v39  ;;  %2030 = vmatmul.msk.f32.gmra.mxu0 %vm300_vm0, %v881_v15 }
 0x247   : > { %v2679_v34 = vpop.f32.mrf.mxu1 }
 0x249   : > { %v882_v17 = vpop.trf.xlu0 }
 0x24a   : > { %2011 = vmatmul.msk.f32.gmra.mxu2 %vm300_vm0, %v704_v40  ;;  %2031 = vmatmul.msk.f32.gmra.mxu0 %vm300_vm0, %v882_v17 }
 0x24f   : > { %v2682_v36 = vpop.f32.mrf.mxu1 }
 0x251   : > { %v883_v20 = vpop.trf.xlu0 }
 0x252   : > { %2012 = vmatmul.msk.f32.gmra.mxu2 %vm300_vm0, %v705_v41  ;;  %2032 = vmatmul.msk.f32.gmra.mxu0 %vm300_vm0, %v883_v20 }
 0x259   : > { %v884_v24 = vpop.trf.xlu0 }
 0x25a   : > { %2013 = vmatmul.msk.f32.gmra.mxu2 %vm300_vm0, %v706_v42  ;;  %2033 = vmatmul.msk.f32.gmra.mxu0 %vm300_vm0, %v884_v24 }
 0x25d   : > { %v2610_v44 = vpop.f32.mrf.mxu2 }
 0x261   : > { %v885_v30 = vpop.trf.xlu0 }
 0x262   : > { %2014 = vmatmul.msk.f32.gmra.mxu2 %vm300_vm0, %v707_v43  ;;  %2034 = vmatmul.msk.f32.gmra.mxu0 %vm300_vm0, %v885_v30 }
 0x265   : > { %v2613_v47 = vpop.f32.mrf.mxu2 }
 0x269   : > { %v886_v31 = vpop.trf.xlu0 }
 0x26a   : > { %2015 = vmatmul.msk.f32.gmra.mxu2 %vm300_vm0, %v708_v46  ;;  %2035 = vmatmul.msk.f32.gmra.mxu0 %vm300_vm0, %v886_v31 }
 0x26d   : > { %v2616_v50 = vpop.f32.mrf.mxu2 }
 0x26e   : > { %3239 = vst [vmem:[#allocation16_spill] sm:$0xff] %v2616_v50 }
 0x271   : > { %v887_v3 = vpop.trf.xlu0 }
 0x272   : > { %2016 = vmatmul.msk.f32.gmra.mxu2 %vm300_vm0, %v709_v49  ;;  %2036 = vmatmul.msk.f32.gmra.mxu0 %vm300_vm0, %v887_v3  ;;  %v1178_v3 = vmul.f32 %v2633_v4, %v2633_v4 }
 0x275   : > { %v2619_v51 = vpop.f32.mrf.mxu2 }
 0x276   : > { %3240 = vst [vmem:[#allocation17_spill] sm:$0xff] %v2619_v51  ;;  %v2375_v51 = vmov 0.0  }
 0x27a   : > { %2017 = vmatmul.msk.f32.gmra.mxu2 %vm300_vm0, %v710_v52 }
 0x27d   : > { %v498_v53 = vpop.f32.mrf.mxu2 }
 0x27e   : > { %504 = vxpose.xlu1.b32.start [1/2] (short) %v498_v53, 128 }
 0x282   : > { %2018 = vmatmul.msk.f32.gmra.mxu2 %vm300_vm0, %v711_v54 }
 0x285   : > { %v501_v55 = vpop.f32.mrf.mxu2 }
 0x286   : > { %505 = vxpose.xlu1.b32.end [2/2] (short) %v501_v55, 128 }
 0x28d   : > { %v777_v0 = vpop.f32.mrf.mxu2 }
 0x295   : > { %v780_v7 = vpop.f32.mrf.mxu2 }
 0x322   : > { %v520_v60 = vpop.trf.xlu1 }
 0x323   : > { %1985 = vmatmul.msk.f32.vlgmr.msrb.gmra.mxu1 %vm300_vm0, %v520_v60 }
 0x32a   : > { %v521_v63 = vpop.trf.xlu1 }
 0x32b   : > { %1986 = vmatmul.msk.f32.gmra.mxu1 %vm300_vm0, %v521_v63 }
 0x332   : > { %v522_v1 = vpop.trf.xlu1 }
 0x333   : > { %1987 = vmatmul.msk.f32.gmra.mxu1 %vm300_vm0, %v522_v1  ;;  %v953_v1 = vpop.f32.mrf.mxu0 }
 0x33a   : > { %v523_v6 = vpop.trf.xlu1 }
 0x33b   : > { %1988 = vmatmul.msk.f32.gmra.mxu1 %vm300_vm0, %v523_v6 }
 0x342   : > { %v524_v9 = vpop.trf.xlu1 }
 0x343   : > { %1989 = vmatmul.msk.f32.gmra.mxu1 %vm300_vm0, %v524_v9  ;;  %v956_v9 = vpop.f32.mrf.mxu0 }
 0x34a   : > { %v525_v12 = vpop.trf.xlu1 }
 0x34b   : > { %1990 = vmatmul.msk.f32.gmra.mxu1 %vm300_vm0, %v525_v12  ;;  %v959_v15 = vpop.f32.mrf.mxu0 }
 0x352   : > { %v526_v14 = vpop.trf.xlu1 }
 0x353   : > { %1991 = vmatmul.msk.f32.gmra.mxu1 %vm300_vm0, %v526_v14  ;;  %v783_v14 = vpop.f32.mrf.mxu2  ;;  %v962_v24 = vpop.f32.mrf.mxu0 }
 0x35a   : > { %v527_v16 = vpop.trf.xlu1 }
 0x35b   : > { %1992 = vmatmul.msk.f32.gmra.mxu1 %vm300_vm0, %v527_v16 }
 0x362   : > { %v528_v19 = vpop.trf.xlu1 }
 0x363   : > { %1993 = vmatmul.msk.f32.gmra.mxu1 %vm300_vm0, %v528_v19  ;;  %v1177_v19 = vmul.f32 %v2629_v62, %v2629_v62 }
 0x36a   : > { %v529_v23 = vpop.trf.xlu1 }
 0x36b   : > { %1994 = vmatmul.msk.f32.vlgmr.msra.gmra.mxu3 %vm300_vm0, %v529_v23  ;;  %2037 = vmatmul.msk.f32.vlgmr.msra.gmra.mxu1 %vm300_vm0, %v1001_v22  ;;  %v786_v23 = vpop.f32.mrf.mxu2 }
 0x372   : > { %v530_v29 = vpop.trf.xlu1 }
 0x373   : > { %1995 = vmatmul.msk.f32.gmra.mxu3 %vm300_vm0, %v530_v29  ;;  %2038 = vmatmul.msk.f32.gmra.mxu1 %vm300_vm0, %v1002_v27  ;;  %v1225_v27 = vsub.f32 %v777_v0, %v1177_v19 }
 0x37a   : > { %v531_v25 = vpop.trf.xlu1 }
 0x37b   : > { %1996 = vmatmul.msk.f32.gmra.mxu3 %vm300_vm0, %v531_v25 }
 0x382   : > { %v532_v32 = vpop.trf.xlu1 }
 0x383   : > { %1997 = vmatmul.msk.f32.gmra.mxu3 %vm300_vm0, %v532_v32 }
 0x38a   : > { %v533_v33 = vpop.trf.xlu1 }
 0x38b   : > { %1998 = vmatmul.msk.f32.gmra.mxu3 %vm300_vm0, %v533_v33 }
 0x392   : > { %v534_v35 = vpop.trf.xlu1 }
 0x393   : > { %1999 = vmatmul.msk.f32.gmra.mxu3 %vm300_vm0, %v534_v35 }
 0x39a   : > { %v535_v37 = vpop.trf.xlu1 }
 0x39b   : > { %2000 = vmatmul.msk.f32.gmra.mxu3 %vm300_vm0, %v535_v37 }
 0x3a0   : > { %v2685_v38 = vpop.f32.mrf.mxu1 }
 0x3a1   : > { %v1193_v17 = vmul.f32 %v2685_v38, %v2685_v38 }
 0x3a3   : > { %v1241_v20 = vsub.f32 %v953_v1, %v1193_v17  ;;  %v1353_v31 = vadd.f32 %v1193_v17, %v1177_v19 }
 0x3a5   : > { %v1385_v30 = vadd.f32 %v1241_v20, %v1225_v27  ;;  %v1369_v35 = vadd.f32 6.5025, %v1353_v31 }
 0x3a7   : > { %v1401_v32 = vadd.f32 58.5225, %v1385_v30 }
 0x3a8   : > { %v2687_v39 = vpop.f32.mrf.mxu1 }
 0x3a9   : > { %v1194_v25 = vmul.f32 %v2687_v39, %v2687_v39 }
 0x3ab   : > { %v1242_v33 = vsub.f32 %v956_v9, %v1194_v25 }
 0x3b0   : > { %v2689_v40 = vpop.f32.mrf.mxu1 }
 0x3b8   : > { %v2691_v41 = vpop.f32.mrf.mxu1 }
 0x3b9   : > { %v1196_v20 = vmul.f32 %v2691_v41, %v2691_v41 }
 0x3bb   : > { %v1244_v30 = vsub.f32 %v962_v24, %v1196_v20  ;;  %v1209_v24 = vmul.f32 %v2685_v38, %v2629_v62 }
 0x3c0   : > { %v2693_v42 = vpop.f32.mrf.mxu1 }
 0x3c8   : > { %v2695_v43 = vpop.f32.mrf.mxu1 }
 0x3d0   : > { %v2697_v45 = vpop.f32.mrf.mxu1 }
 0x3d8   : > { %v2699_v46 = vpop.f32.mrf.mxu1 }
 0x3e0   : > { %v2701_v48 = vpop.f32.mrf.mxu1 }
 0x3e8   : > { %v1026_v49 = vpop.f32.mrf.mxu1 }
 0x3e9   : > { %1032 = vxpose.xlu1.b32.start [1/2] (short) %v1026_v49, 128 }
 0x3ee   : > { %v2711_v61 = vpop.f32.mrf.mxu3 }
 0x3f0   : > { %v1029_v52 = vpop.f32.mrf.mxu1 }
 0x3f1   : > { %1033 = vxpose.xlu1.b32.end [2/2] (short) %v1029_v52, 128  ;;  %v1226_v52 = vsub.f32 %v780_v7, %v1178_v3 }
 0x3f6   : > { %v2715_v6 = vpop.f32.mrf.mxu3 }
 0x3fe   : > { %v2718_v12 = vpop.f32.mrf.mxu3 }
 0x406   : > { %v2725_v22 = vpop.f32.mrf.mxu3 }
 0x40e   : > { %v2732_v37 = vpop.f32.mrf.mxu3 }
 0x416   : > { %v2743_v7 = vpop.f32.mrf.mxu3 }
 0x417   : > { %3241 = vst [vmem:[#allocation18_spill] sm:$0xff] %v2743_v7 }
 0x48d   : > { %v1048_v53 = vpop.trf.xlu1 }
 0x48e   : > { %2039 = vmatmul.msk.f32.vlgmr.msrb.gmra.mxu3 %vm300_vm0, %v1048_v53  ;;  %v789_v53 = vpop.f32.mrf.mxu2 }
 0x495   : > { %v1049_v54 = vpop.trf.xlu1 }
 0x496   : > { %2040 = vmatmul.msk.f32.gmra.mxu3 %vm300_vm0, %v1049_v54  ;;  %v965_v54 = vpop.f32.mrf.mxu0  ;;  %v2745_v9 = vpop.f32.mrf.mxu2 }
 0x49d   : > { %v1050_v55 = vpop.trf.xlu1 }
 0x49e   : > { %2041 = vmatmul.msk.f32.gmra.mxu3 %vm300_vm0, %v1050_v55  ;;  %v2735_v55 = vmul.f32 %v1401_v32, %v1369_v35  ;;  %v2749_v17 = vpop.f32.mrf.mxu0 }
 0x4a0   : > { %2139 = vrcp.f32 %v2735_v55  ;;  %vm1438_vm2 = vweird.f32 %v2735_v55 }
 0x4a5   : > { %v1051_v56 = vpop.trf.xlu1 }
 0x4a6   : > { %2042 = vmatmul.msk.f32.gmra.mxu3 %vm300_vm0, %v1051_v56  ;;  %v1386_v56 = vadd.f32 %v1242_v33, %v1226_v52  ;;  %v2751_v19 = vpop.eup %2139  ;;  %v1197_v33 = vmul.f32 %v2693_v42, %v2693_v42  ;;  %v2765_v52 = vpop.f32.mrf.mxu3 }
 0x4a7   : > { %v1434_v27 = vmul.f32 %v2751_v19, %v2735_v55  ;;  %3242 = vst [vmem:[#allocation19_spill] sm:$0xff] %v2765_v52  ;;  %vm1439_vm1 = vweird.f32 %v2751_v19 }
 0x4a8   : > { %vm2798_vm3 = vmor %vm1438_vm2, %vm1439_vm1 }
 0x4a9   : > { %v1435_v35 = vsub.f32 1.0, %v1434_v27 }
 0x4ad   : > { %v1052_v57 = vpop.trf.xlu1 }
 0x4ae   : > { %2043 = vmatmul.msk.f32.gmra.mxu3 %vm300_vm0, %v1052_v57  ;;  %v1195_v57 = vmul.f32 %v2689_v40, %v2689_v40 }
 0x4b5   : > { %v1053_v58 = vpop.trf.xlu1 }
 0x4b6   : > { %2044 = vmatmul.msk.f32.gmra.mxu3 %vm300_vm0, %v1053_v58  ;;  %v1354_v58 = vadd.f32 %v1194_v25, %v1178_v3 }
 0x4bd   : > { %v1054_v59 = vpop.trf.xlu1 }
 0x4be   : > { %2045 = vmatmul.msk.f32.gmra.mxu3 %vm300_vm0, %v1054_v59  ;;  %v1179_v59 = vmul.f32 %v2638_v8, %v2638_v8 }
 0x4c0   : > { %v1227_v1 = vsub.f32 %v783_v14, %v1179_v59 }
 0x4c5   : > { %v1055_v60 = vpop.trf.xlu1 }
 0x4c6   : > { %2046 = vmatmul.msk.f32.gmra.mxu3 %vm300_vm0, %v1055_v60  ;;  %v1402_v60 = vadd.f32 58.5225, %v1386_v56 }
 0x4cd   : > { %v1056_v63 = vpop.trf.xlu1 }
 0x4ce   : > { %2047 = vmatmul.msk.f32.gmra.mxu3 %vm300_vm0, %v1056_v63  ;;  %v1243_v63 = vsub.f32 %v959_v15, %v1195_v57  ;;  %v1355_v15 = vadd.f32 %v1195_v57, %v1179_v59  ;;  %v2769_v57 = vpop.f32.mrf.mxu2 }
 0x4d0   : > { %v1371_v31 = vadd.f32 6.5025, %v1355_v15  ;;  %v1273_v15 = vmul.f32 2.0, %v1209_v24 }
 0x4d5   : > { %v1057_v5 = vpop.trf.xlu1 }
 0x4d6   : > { %2048 = vmatmul.msk.f32.gmra.mxu3 %vm300_vm0, %v1057_v5  ;;  %v1370_v5 = vadd.f32 6.5025, %v1354_v58  ;;  %v2773_v58 = vpop.f32.mrf.mxu0 }
 0x4dd   : > { %v1058_v10 = vpop.trf.xlu1 }
 0x4de   : > { %2049 = vmatmul.msk.f32.gmra.mxu3 %vm300_vm0, %v1058_v10  ;;  %v2747_v10 = vmul.f32 %v1402_v60, %v1370_v5  ;;  %v1181_v60 = vmul.f32 %v2646_v13, %v2646_v13 }
 0x4e0   : > { %2141 = vrcp.f32 %v2747_v10  ;;  %vm1453_vm9 = vweird.f32 %v2747_v10 }
 0x4e5   : > { %v1059_v16 = vpop.trf.xlu1 }
 0x4e6   : > { %2050 = vmatmul.msk.f32.gmra.mxu3 %vm300_vm0, %v1059_v16  ;;  %v1387_v16 = vadd.f32 %v1243_v63, %v1227_v1  ;;  %v2767_v56 = vpop.eup %2141  ;;  %v1245_v63 = vsub.f32 %v965_v54, %v1197_v33  ;;  %v2787_v54 = vmul.f32 %v2656_v21, %v2656_v21 }
 0x4e7   : > { %v1449_v5 = vmul.f32 %v2767_v56, %v2747_v10  ;;  %vm1454_vm8 = vweird.f32 %v2767_v56 }
 0x4e8   : > { %v1403_v14 = vadd.f32 58.5225, %v1387_v16  ;;  %v1229_v16 = vsub.f32 %v789_v53, %v1181_v60  ;;  %v1198_v53 = vmul.f32 %v2695_v43, %v2695_v43  ;;  %vm2837_vm10 = vmor %vm1453_vm9, %vm1454_vm8 }
 0x4ea   : > { %v2761_v3 = vmul.f32 %v1403_v14, %v1371_v31  ;;  %v1389_v27 = vadd.f32 %v1245_v63, %v1229_v16  ;;  %v1450_v31 = vsub.f32 1.0, %v1449_v5  ;;  %v2805_v16 = vpop.f32.mrf.mxu0 }
 0x4ec   : > { %2143 = vrcp.f32 %v2761_v3  ;;  %v1405_v5 = vadd.f32 58.5225, %v1389_v27  ;;  %vm1468_vm13 = vweird.f32 %v2761_v3 }
 0x4ed   : > { %v1060_v29 = vpop.trf.xlu1 }
 0x4ee   : > { %2051 = vmatmul.msk.f32.gmra.mxu3 %vm300_vm0, %v1060_v29  ;;  %v1180_v29 = vmul.f32 %v2643_v11, %v2643_v11 }
 0x4f0   : > { %v1228_v32 = vsub.f32 %v786_v23, %v1180_v29  ;;  %v1356_v59 = vadd.f32 %v1196_v20, %v1180_v29  ;;  %v1673_v23 = vlaneseq  ;;  %v1182_v20 = vmul.f32 %v2650_v18, %v2650_v18 }
 0x4f2   : > { %v1372_v14 = vadd.f32 6.5025, %v1356_v59  ;;  %v1674_v62 = vshrl.u32 %v1673_v23, 7  ;;  %v1691_v38 = vand.u32 127, %v1673_v23  ;;  %v1210_v23 = vmul.f32 %v2687_v39, %v2633_v4 }
 0x4f3   : > { %v1442_v4 = vand.u32 2147483647, %v2735_v55  ;;  %v1246_v39 = vsub.f32 %v2749_v17, %v1198_v53 }
 0x4f4   : > { %vm1692_vm4 = vcmp.lt.s32.totalorder %v1674_v62, 6  ;;  %vm1708_vm5 = vcmp.lt.s32.totalorder %v1691_v38, 6  ;;  %v1199_v38 = vmul.f32 %v2697_v45, %v2697_v45 }
 0x4f5   : > { %v1061_v49 = vpop.trf.xlu1  ;;  %vm1709_vm6 = vmand %vm1692_vm4, %vm1708_vm5  ;;  %vm1443_vm7 = vcmp.eq.f32.partialorder %v1442_v4, 8.507059e+37 }
 0x4f6   : > { %2052 = vmatmul.msk.f32.gmra.mxu3 %vm300_vm0, %v1061_v49  ;;  %v1388_v49 = vadd.f32 %v1244_v30, %v1228_v32  ;;  %v2793_v32 = vpop.eup %2143  ;;  %v1247_v52 = vsub.f32 %v2773_v58, %v1199_v38  ;;  %v1457_v58 = vand.u32 2147483647, %v2747_v10 }
 0x4f7   : > { %vm1469_vm12 = vweird.f32 %v2793_v32 }
 0x4f8   : > { %v1404_v1 = vadd.f32 58.5225, %v1388_v49  ;;  %v1357_v49 = vadd.f32 %v1197_v33, %v1181_v60  ;;  %v1451_v60 = vmul.f32 %v2767_v56, %v1450_v31  ;;  %vm1458_vm11 = vcmp.eq.f32.partialorder %v1457_v58, 8.507059e+37  ;;  %vm2872_vm14 = vmor %vm1468_vm13, %vm1469_vm12 }
 0x4fa   : > { %v2789_v30 = vmul.f32 %v1404_v1, %v1372_v14  ;;  %v2803_v1 = vpop.f32.mrf.mxu2  ;;  %v1373_v14 = vadd.f32 6.5025, %v1357_v49 }
 0x4fc   : > { %2145 = vrcp.f32 %v2789_v30  ;;  %v2822_v17 = vmul.f32 %v1405_v5, %v1373_v14  ;;  %v1459_v5 = vand.u32 2147483648, %v2747_v10  ;;  %vm1483_vm1 = vweird.f32 %v2789_v30 }
 0x4fd   : > { %v1062_v0 = vpop.trf.xlu1 }
 0x4fe   : > { %2053 = vmatmul.msk.f32.gmra.mxu3 %vm300_vm0, %v1062_v0  ;;  %v1436_v0 = vmul.f32 %v2751_v19, %v1435_v35  ;;  %v1289_v35 = vadd.f32 6.5025, %v1273_v15  ;;  %v1464_v15 = vmul.f32 %v2793_v32, %v2761_v3  ;;  %2147 = vrcp.f32 %v2822_v17 }
 0x4ff   : > { %vm1498_vm5 = vweird.f32 %v2822_v17 }
 0x500   : > { %v1437_v29 = vadd.f32 %v2751_v19, %v1436_v0  ;;  %v1444_v0 = vand.u32 2147483648, %v2735_v55  ;;  %v1231_v55 = vsub.f32 %v2769_v57, %v2787_v54  ;;  %v1465_v62 = vsub.f32 1.0, %v1464_v15 }
 0x501   : > { %v1452_v57 = vadd.f32 %v2767_v56, %v1451_v60  ;;  %v1184_v15 = vmul.f32 %v2663_v26, %v2663_v26 }
 0x502   : > { %v2827_v7 = vpop.eup %2145 }
 0x503   : > { %v1479_v10 = vmul.f32 %v2827_v7, %v2789_v30  ;;  %v1232_v58 = vsub.f32 %v2803_v1, %v1184_v15 }
 0x505   : > { %v1063_v25 = vpop.trf.xlu1 }
 0x506   : > { %2054 = vmatmul.msk.f32.gmra.mxu3 %vm300_vm0, %v1063_v25  ;;  %vm1484_vm0 = vweird.f32 %v2827_v7 }
 0x507   : > { %vm2906_vm2 = vmor %vm1483_vm1, %vm1484_vm0 }
 0x511   : > { %v1129_v25 = vpop.f32.mrf.mxu3 }
 0x512   : > { %v1257_v59 = vsub.f32 %v1129_v25, %v1209_v24  ;;  %v1441_v24 = vsel %vm2798_vm3, %v2751_v19, %v1437_v29  ;;  %v1230_v19 = vsub.f32 %v2745_v9, %v1182_v20  ;;  %v1274_v29 = vmul.f32 2.0, %v1210_v23 }
 0x513   : > { %v1445_v25 = vor.u32 1.1754944e-38, %v1444_v0  ;;  %v1358_v0 = vadd.f32 %v1198_v53, %v1182_v20  ;;  %v1391_v20 = vadd.f32 %v1247_v52, %v1231_v55  ;;  %v2844_v53 = vpop.f32.mrf.mxu0  ;;  %v1359_v55 = vadd.f32 %v1199_v38, %v2787_v54 }
 0x514   : > { %v1305_v33 = vmul.f32 2.0, %v1257_v59  ;;  %v1390_v49 = vadd.f32 %v1246_v39, %v1230_v19  ;;  %v1460_v19 = vor.u32 1.1754944e-38, %v1459_v5  ;;  %v1474_v38 = vand.u32 2147483648, %v2761_v3 }
 0x515   : > { %v1446_v63 = vsel %vm1443_vm7, %v1445_v25, %v1441_v24  ;;  %v1374_v14 = vadd.f32 6.5025, %v1358_v0  ;;  %v1375_v0 = vadd.f32 6.5025, %v1359_v55  ;;  %v1185_v39 = vmul.f32 %v2670_v2, %v2670_v2 }
 0x516   : > { %v1321_v27 = vadd.f32 58.5225, %v1305_v33  ;;  %v2055_v33 = vsel %vm1709_vm6, 1.0, %v2375_v51  ;;  %v1406_v4 = vadd.f32 58.5225, %v1390_v49 }
 0x518   : > { %v1337_v31 = vmul.f32 %v1321_v27, %v1289_v35  ;;  %v1211_v35 = vmul.f32 %v2689_v40, %v2638_v8  ;;  %v1466_v8 = vmul.f32 %v2793_v32, %v1465_v62  ;;  %v2842_v40 = vpop.f32.mrf.mxu2  ;;  %v1200_v27 = vmul.f32 %v2699_v46, %v2699_v46 }
 0x519   : > { %v1132_v59 = vpop.f32.mrf.mxu3  ;;  %v2856_v25 = vmul.f32 %v1406_v4, %v1374_v14 }
 0x51a   : > { %v1258_v9 = vsub.f32 %v1132_v59, %v1210_v23  ;;  %v1447_v50 = vmul.f32 %v1446_v63, %v1337_v31  ;;  %v1290_v23 = vadd.f32 6.5025, %v1274_v29  ;;  %v1275_v52 = vmul.f32 2.0, %v1211_v35  ;;  %v2860_v59 = vpop.eup %2147 }
 0x51b   : > { %v1467_v49 = vadd.f32 %v2793_v32, %v1466_v8  ;;  %v1407_v63 = vadd.f32 58.5225, %v1391_v20  ;;  %v1248_v54 = vsub.f32 %v2805_v16, %v1200_v27  ;;  %2149 = vrcp.f32 %v2856_v25 }
 0x51c   : > { %v1306_v51 = vmul.f32 2.0, %v1258_v9  ;;  %v1757_v24 = vmul.f32 %v2055_v33, %v1447_v50  ;;  %v1456_v50 = vsel %vm2837_vm10, %v2767_v56, %v1452_v57  ;;  %v1480_v9 = vsub.f32 1.0, %v1479_v10 }
 0x51d   : > { %v1461_v56 = vsel %vm1458_vm11, %v1460_v19, %v1456_v50  ;;  %v1212_v57 = vmul.f32 %v2691_v41, %v2643_v11  ;;  %v1494_v41 = vmul.f32 %v2860_v59, %v2822_v17  ;;  %v2878_v16 = vmul.f32 %v1407_v63, %v1375_v0 }
 0x51e   : > { %v1322_v60 = vadd.f32 58.5225, %v1306_v51  ;;  %1773 = vadd.xlane.f32.xlu2 %v1757_v24  ;;  %v1472_v24 = vand.u32 2147483647, %v2761_v3  ;;  %v1471_v3 = vsel %vm2872_vm14, %v2793_v32, %v1467_v49  ;;  %v1481_v1 = vmul.f32 %v2827_v7, %v1480_v9 }
 0x51f   : > { %v1392_v8 = vadd.f32 %v1248_v54, %v1232_v58  ;;  %v1475_v20 = vor.u32 1.1754944e-38, %v1474_v38  ;;  %v1276_v50 = vmul.f32 2.0, %v1212_v57  ;;  %v1201_v10 = vmul.f32 %v2701_v48, %v2701_v48 }
 0x520   : > { %v1338_v29 = vmul.f32 %v1322_v60, %v1290_v23  ;;  %v1291_v23 = vadd.f32 6.5025, %v1275_v52  ;;  %v2888_v60 = vpop.f32.mrf.mxu2  ;;  %vm1473_vm15 = vcmp.eq.f32.partialorder %v1472_v24, 8.507059e+37  ;;  %v1360_v19 = vadd.f32 %v1200_v27, %v1184_v15 }
 0x521   : > { %v1135_v31 = vpop.f32.mrf.mxu3  ;;  %v1476_v55 = vsel %vm1473_vm15, %v1475_v20, %v1471_v3  ;;  %v1495_v32 = vsub.f32 1.0, %v1494_v41  ;;  %2151 = vrcp.f32 %v2878_v16  ;;  %v2895_v49 = vpop.eup %2149  ;;  %v1213_v63 = vmul.f32 %v2693_v42, %v2646_v13 }
 0x522   : > { %v1259_v33 = vsub.f32 %v1135_v31, %v1211_v35  ;;  %v1462_v62 = vmul.f32 %v1461_v56, %v1338_v29  ;;  %v2880_v35 = vpop.f32.mrf.mxu0  ;;  %v1482_v56 = vadd.f32 %v2827_v7, %v1481_v1  ;;  %v1489_v15 = vand.u32 2147483648, %v2789_v30 }
 0x523   : > { %v1249_v27 = vsub.f32 %v2844_v53, %v1201_v10  ;;  %v1487_v54 = vand.u32 2147483647, %v2789_v30  ;;  %v1376_v38 = vadd.f32 6.5025, %v1360_v19  ;;  %v1496_v13 = vmul.f32 %v2860_v59, %v1495_v32 }
 0x524   : > { %v1307_v5 = vmul.f32 2.0, %v1259_v33  ;;  %v1758_v51 = vmul.f32 0.0, %v1462_v62  ;;  %v1408_v33 = vadd.f32 58.5225, %v1392_v8  ;;  %v1292_v42 = vadd.f32 6.5025, %v1276_v50 }
 0x525   : > { %v1486_v53 = vsel %vm2906_vm2, %v2827_v7, %v1482_v56  ;;  %v1509_v30 = vmul.f32 %v2895_v49, %v2856_v25  ;;  %v1490_v24 = vor.u32 1.1754944e-38, %v1489_v15  ;;  %vm1488_vm3 = vcmp.eq.f32.partialorder %v1487_v54, 8.507059e+37 }
 0x526   : > { %v1323_v4 = vadd.f32 58.5225, %v1307_v5  ;;  %1775 = vadd.xlane.f32.xlu0 %v1758_v51  ;;  %v2916_v51 = vmul.f32 %v1408_v33, %v1376_v38  ;;  %v1202_v7 = vmul.f32 %v2711_v61, %v2711_v61  ;;  %v1497_v8 = vadd.f32 %v2860_v59, %v1496_v13 }
 0x527   : > { %v2918_v58 = vpop.eup %2151  ;;  %v1491_v1 = vsel %vm1488_vm3, %v1490_v24, %v1486_v53  ;;  %vm1499_vm4 = vweird.f32 %v2860_v59  ;;  %v1361_v50 = vadd.f32 %v1201_v10, %v1185_v39  ;;  %v2940_v10 = vmul.f32 %v2679_v34, %v2679_v34 }
 0x528   : > { %v1339_v14 = vmul.f32 %v1323_v4, %v1291_v23  ;;  %v1214_v23 = vmul.f32 %v2695_v43, %v2650_v18  ;;  %v2928_v20 = vpop.f32.mrf.mxu2  ;;  %v1510_v18 = vsub.f32 1.0, %v1509_v30  ;;  %2153 = vrcp.f32 %v2916_v51  ;;  %vm2945_vm6 = vmor %vm1498_vm5, %vm1499_vm4 }
 0x529   : > { %v1138_v52 = vpop.f32.mrf.mxu3  ;;  %v1504_v43 = vand.u32 2147483648, %v2822_v17  ;;  %v1377_v15 = vadd.f32 6.5025, %v1361_v50  ;;  %v1215_v38 = vmul.f32 %v2697_v45, %v2656_v21  ;;  %vm1513_vm8 = vweird.f32 %v2856_v25 }
 0x52a   : > { %v1260_v29 = vsub.f32 %v1138_v52, %v1212_v57  ;;  %v1477_v31 = vmul.f32 %v1476_v55, %v1339_v14  ;;  %v1233_v57 = vsub.f32 %v2842_v40, %v1185_v39  ;;  %v1277_v40 = vmul.f32 2.0, %v1213_v63  ;;  %v2922_v41 = vpop.f32.mrf.mxu0 }
 0x52b   : > { %v1524_v52 = vmul.f32 %v2918_v58, %v2878_v16  ;;  %v1186_v39 = vmul.f32 %v2675_v28, %v2675_v28  ;;  %v1278_v54 = vmul.f32 2.0, %v1214_v23  ;;  %vm1514_vm9 = vweird.f32 %v2895_v49 }
 0x52c   : > { %v1308_v62 = vmul.f32 2.0, %v1260_v29  ;;  %v1759_v9 = vmul.f32 0.0, %v1477_v31  ;;  %v1393_v11 = vadd.f32 %v1249_v27, %v1233_v57  ;;  %v1502_v31 = vand.u32 2147483647, %v2822_v17  ;;  %vm2976_vm10 = vmor %vm1513_vm8, %vm1514_vm9 }
 0x52d   : > { %v1293_v56 = vadd.f32 6.5025, %v1277_v40  ;;  %v1501_v17 = vsel %vm2945_vm6, %v2860_v59, %v1497_v8  ;;  %v1505_v57 = vor.u32 1.1754944e-38, %v1504_v43  ;;  %v1203_v59 = vmul.f32 %v2715_v6, %v2715_v6 }
 0x52e   : > { %v1324_v5 = vadd.f32 58.5225, %v1308_v62  ;;  %1777 = vadd.xlane.f32.xlu1 %v1759_v9  ;;  %v1409_v55 = vadd.f32 58.5225, %v1393_v11  ;;  %v1511_v62 = vmul.f32 %v2895_v49, %v1510_v18  ;;  %v1234_v9 = vsub.f32 %v2888_v60, %v1186_v39 }
 0x52f   : > { %vm1503_vm7 = vcmp.eq.f32.partialorder %v1502_v31, 8.507059e+37  ;;  %v1362_v45 = vadd.f32 %v1202_v7, %v1186_v39  ;;  %v1517_v11 = vand.u32 2147483647, %v2856_v25  ;;  %v1235_v18 = vsub.f32 %v2928_v20, %v2940_v10 }
 0x530   : > { %v1340_v4 = vmul.f32 %v1324_v5, %v1292_v42  ;;  %v2956_v0 = vmul.f32 %v1409_v55, %v1377_v15  ;;  %v2958_v42 = vpop.eup %2153  ;;  %v1506_v30 = vsel %vm1503_vm7, %v1505_v57, %v1501_v17  ;;  %v1512_v21 = vadd.f32 %v2895_v49, %v1511_v62 }
 0x531   : > { %v1141_v3 = vpop.f32.mrf.mxu3  ;;  %v1294_v43 = vadd.f32 6.5025, %v1278_v54  ;;  %vm1518_vm11 = vcmp.eq.f32.partialorder %v1517_v11, 8.507059e+37  ;;  %vm1529_vm12 = vweird.f32 %v2918_v58  ;;  %vm1528_vm13 = vweird.f32 %v2878_v16 }
 0x532   : > { %v1261_v14 = vsub.f32 %v1141_v3, %v1213_v63  ;;  %v1492_v19 = vmul.f32 %v1491_v1, %v1340_v4  ;;  %v1250_v63 = vsub.f32 %v2880_v35, %v1202_v7  ;;  %v1525_v35 = vsub.f32 1.0, %v1524_v52  ;;  %v2963_v60 = vpop.f32.mrf.mxu0  ;;  %v810_v1 = vpop.f32.mrf.mxu2  ;;  %vm3002_vm14 = vmor %vm1528_vm13, %vm1529_vm12 }
 0x533   : > { %v1519_v4 = vand.u32 2147483648, %v2856_v25  ;;  %2155 = vrcp.f32 %v2956_v0  ;;  %v1516_v55 = vsel %vm2976_vm10, %v2895_v49, %v1512_v21  ;;  %v1534_v62 = vand.u32 2147483648, %v2878_v16 }
 0x534   : > { %v1309_v32 = vmul.f32 2.0, %v1261_v14  ;;  %v1760_v29 = vmul.f32 0.0, %v1492_v19  ;;  %v1394_v5 = vadd.f32 %v1250_v63, %v1234_v9  ;;  %v1526_v3 = vmul.f32 %v2918_v58, %v1525_v35 }
 0x535   : > { %v1251_v19 = vsub.f32 %v2922_v41, %v1203_v59  ;;  %v1520_v41 = vor.u32 1.1754944e-38, %v1519_v4  ;;  %v1204_v63 = vmul.f32 %v2718_v12, %v2718_v12  ;;  %v1188_v9 = vmul.f32 %v2682_v36, %v2682_v36 }
 0x536   : > { %v1325_v27 = vadd.f32 58.5225, %v1309_v32  ;;  %1779 = vadd.xlane.f32.xlu2 %v1760_v29  ;;  %v1410_v14 = vadd.f32 58.5225, %v1394_v5  ;;  %v1279_v32 = vmul.f32 2.0, %v1215_v38  ;;  %v1527_v25 = vadd.f32 %v2918_v58, %v1526_v3 }
 0x537   : > { %v1378_v29 = vadd.f32 6.5025, %v1362_v45  ;;  %v1395_v20 = vadd.f32 %v1251_v19, %v1235_v18  ;;  %v1521_v15 = vsel %vm1518_vm11, %v1520_v41, %v1516_v55  ;;  %v1216_v54 = vmul.f32 %v2699_v46, %v2663_v26 }
 0x538   : > { %v1341_v13 = vmul.f32 %v1325_v27, %v1293_v56  ;;  %v1363_v57 = vadd.f32 %v1203_v59, %v2940_v10  ;;  %v1252_v46 = vsub.f32 %v2963_v60, %v1204_v63  ;;  %v1535_v21 = vor.u32 1.1754944e-38, %v1534_v62 }
 0x539   : > { %v1144_v53 = vpop.f32.mrf.mxu3  ;;  %v2987_v56 = vmul.f32 %v1410_v14, %v1378_v29  ;;  %v2991_v27 = vpop.eup %2155  ;;  %v1411_v26 = vadd.f32 58.5225, %v1395_v20  ;;  %v1236_v45 = vsub.f32 %v810_v1, %v1188_v9  ;;  %v1280_v11 = vmul.f32 2.0, %v1216_v54 }
 0x53a   : > { %v1262_v40 = vsub.f32 %v1144_v53, %v1214_v23  ;;  %v1507_v24 = vmul.f32 %v1506_v30, %v1341_v13  ;;  %v1539_v23 = vmul.f32 %v2958_v42, %v2916_v51  ;;  %v989_v13 = vpop.f32.mrf.mxu0  ;;  %v1531_v30 = vsel %vm3002_vm14, %v2918_v58, %v1527_v25  ;;  %v813_v59 = vpop.f32.mrf.mxu2 }
 0x53b   : > { %2157 = vrcp.f32 %v2987_v56  ;;  %v1554_v10 = vmul.f32 %v2991_v27, %v2956_v0  ;;  %v1379_v4 = vadd.f32 6.5025, %v1363_v57  ;;  %vm1544_vm0 = vweird.f32 %v2958_v42 }
 0x53c   : > { %v1310_v8 = vmul.f32 2.0, %v1262_v40  ;;  %v1761_v50 = vmul.f32 0.0, %v1507_v24  ;;  %v1540_v39 = vsub.f32 1.0, %v1539_v23  ;;  %v1295_v24 = vadd.f32 6.5025, %v1279_v32 }
 0x53d   : > { %v1396_v60 = vadd.f32 %v1252_v46, %v1236_v45  ;;  %v1205_v23 = vmul.f32 %v2725_v22, %v2725_v22  ;;  %v1555_v19 = vsub.f32 1.0, %v1554_v10  ;;  %vm1543_vm1 = vweird.f32 %v2916_v51 }
 0x53e   : > { %v1326_v52 = vadd.f32 58.5225, %v1310_v8  ;;  %1781 = vadd.xlane.f32.xlu2 %v1761_v50  ;;  %v1541_v40 = vmul.f32 %v2958_v42, %v1540_v39  ;;  %v3017_v50 = vmul.f32 %v1411_v26, %v1379_v4  ;;  %v1549_v1 = vand.u32 2147483648, %v2916_v51  ;;  %vm3027_vm2 = vmor %vm1543_vm1, %vm1544_vm0 }
 0x53f   : > { %v1364_v55 = vadd.f32 %v1204_v63, %v1188_v9  ;;  %v1547_v29 = vand.u32 2147483647, %v2916_v51  ;;  %v1217_v41 = vmul.f32 %v2701_v48, %v2670_v2  ;;  %v1412_v20 = vadd.f32 58.5225, %v1396_v60 }
 0x540   : > { %v1342_v31 = vmul.f32 %v1326_v52, %v1294_v43  ;;  %v1542_v8 = vadd.f32 %v2958_v42, %v1541_v40  ;;  %v1189_v52 = vmul.f32 %v2610_v44, %v2610_v44  ;;  %2159 = vrcp.f32 %v3017_v50 }
 0x541   : > { %v1147_v33 = vpop.f32.mrf.mxu3  ;;  %v3023_v43 = vpop.eup %2157  ;;  %v1556_v63 = vmul.f32 %v2991_v27, %v1555_v19  ;;  %v1550_v51 = vor.u32 1.1754944e-38, %v1549_v1  ;;  %v1380_v62 = vadd.f32 6.5025, %v1364_v55  ;;  %vm1548_vm3 = vcmp.eq.f32.partialorder %v1547_v29, 8.507059e+37  ;;  %v3261_v29 = vld [vmem:[#allocation18_spill] sm:$0xff] }
 0x542   : > { %v1263_v49 = vsub.f32 %v1147_v33, %v1215_v38  ;;  %v1522_v17 = vmul.f32 %v1521_v15, %v1342_v31  ;;  %v1532_v38 = vand.u32 2147483647, %v2878_v16  ;;  %v1546_v39 = vsel %vm3027_vm2, %v2958_v42, %v1542_v8  ;;  %v816_v9 = vpop.f32.mrf.mxu2 }
 0x543   : > { %v1253_v33 = vsub.f32 %v989_v13, %v1205_v23  ;;  %v1296_v15 = vadd.f32 6.5025, %v1280_v11  ;;  %v1569_v2 = vmul.f32 %v3023_v43, %v2987_v56  ;;  %v1237_v48 = vsub.f32 %v813_v59, %v1189_v52 }
 0x544   : > { %v1311_v5 = vmul.f32 2.0, %v1263_v49  ;;  %v1762_v53 = vmul.f32 0.0, %v1522_v17  ;;  %vm1533_vm15 = vcmp.eq.f32.partialorder %v1532_v38, 8.507059e+37  ;;  %v992_v49 = vpop.f32.mrf.mxu0  ;;  %v1551_v57 = vsel %vm1548_vm3, %v1550_v51, %v1546_v39 }
 0x545   : > { %v1536_v3 = vsel %vm1533_vm15, %v1535_v21, %v1531_v30  ;;  %vm1559_vm4 = vweird.f32 %v2991_v27  ;;  %v3042_v35 = vmul.f32 %v1412_v20, %v1380_v62  ;;  %v1397_v38 = vadd.f32 %v1253_v33, %v1237_v48 }
 0x546   : > { %v1327_v16 = vadd.f32 58.5225, %v1311_v5  ;;  %1783 = vadd.xlane.f32.xlu2 %v1762_v53  ;;  %v1206_v13 = vmul.f32 %v2732_v37, %v2732_v37  ;;  %v1557_v53 = vadd.f32 %v2991_v27, %v1556_v63  ;;  %v1564_v26 = vand.u32 2147483648, %v2956_v0  ;;  %v3048_v10 = vpop.eup %2159 }
 0x547   : > { %v1570_v46 = vsub.f32 1.0, %v1569_v2  ;;  %v1190_v59 = vmul.f32 %v2613_v47, %v2613_v47  ;;  %vm1558_vm5 = vweird.f32 %v2956_v0  ;;  %v1218_v45 = vmul.f32 %v2711_v61, %v2675_v28 }
 0x548   : > { %v1343_v58 = vmul.f32 %v1327_v16, %v1295_v24  ;;  %v1365_v24 = vadd.f32 %v1205_v23, %v1189_v52  ;;  %v1562_v16 = vand.u32 2147483647, %v2956_v0  ;;  %vm3058_vm6 = vmor %vm1558_vm5, %vm1559_vm4  ;;  %2161 = vrcp.f32 %v3042_v35 }
 0x549   : > { %v1150_v14 = vpop.f32.mrf.mxu3  ;;  %v1254_v8 = vsub.f32 %v992_v49, %v1206_v13  ;;  %v1561_v0 = vsel %vm3058_vm6, %v2991_v27, %v1557_v53  ;;  %v1565_v23 = vor.u32 1.1754944e-38, %v1564_v26  ;;  %v1571_v28 = vmul.f32 %v3023_v43, %v1570_v46 }
 0x54a   : > { %v1264_v7 = vsub.f32 %v1150_v14, %v1216_v54  ;;  %v1537_v18 = vmul.f32 %v1536_v3, %v1343_v58  ;;  %v1281_v54 = vmul.f32 2.0, %v1217_v41  ;;  %v1413_v3 = vadd.f32 58.5225, %v1397_v38 }
 0x54b   : > { %v1584_v61 = vmul.f32 %v3048_v10, %v3017_v50  ;;  %v1238_v14 = vsub.f32 %v816_v9, %v1190_v59  ;;  %v1381_v19 = vadd.f32 6.5025, %v1365_v24  ;;  %vm1563_vm7 = vcmp.eq.f32.partialorder %v1562_v16, 8.507059e+37  ;;  %v3265_v24 = vld [vmem:[#allocation19_spill] sm:$0xff] }
 0x54c   : > { %v1312_v31 = vmul.f32 2.0, %v1264_v7  ;;  %v1763_v25 = vmul.f32 0.0, %v1537_v18  ;;  %v1297_v21 = vadd.f32 6.5025, %v1281_v54  ;;  %v1282_v7 = vmul.f32 2.0, %v1218_v45  ;;  %v995_v18 = vpop.f32.mrf.mxu0 }
 0x54d   : > { %v1566_v52 = vsel %vm1563_vm7, %v1565_v23, %v1561_v0  ;;  %v3069_v55 = vmul.f32 %v1413_v3, %v1381_v19  ;;  %v1398_v32 = vadd.f32 %v1254_v8, %v1238_v14  ;;  %v1207_v27 = vmul.f32 %v3261_v29, %v3261_v29  ;;  %v3266_v0 = vld [vmem:[#allocation17_spill] sm:$0xff] }
 0x54e   : > { %v1328_v17 = vadd.f32 58.5225, %v1312_v31  ;;  %1785 = vadd.xlane.f32.xlu2 %v1763_v25  ;;  %vm1574_vm8 = vweird.f32 %v3023_v43  ;;  %v819_v31 = vpop.f32.mrf.mxu2  ;;  %v1572_v20 = vadd.f32 %v3023_v43, %v1571_v28  ;;  %v1585_v33 = vsub.f32 1.0, %v1584_v61  ;;  %v3075_v63 = vpop.eup %2161 }
 0x54f   : > { %v1366_v51 = vadd.f32 %v1206_v13, %v1190_v59  ;;  %v1579_v2 = vand.u32 2147483648, %v2987_v56  ;;  %vm1573_vm9 = vweird.f32 %v2987_v56  ;;  %v1577_v9 = vand.u32 2147483647, %v2987_v56 }
 0x550   : > { %v1344_v42 = vmul.f32 %v1328_v17, %v1296_v15  ;;  %v3262_v15 = vld [vmem:[#allocation16_spill] sm:$0xff]  ;;  %v1219_v17 = vmul.f32 %v2715_v6, %v2679_v34  ;;  %v1298_v54 = vadd.f32 6.5025, %v1282_v7  ;;  %2163 = vrcp.f32 %v3069_v55  ;;  %vm3087_vm10 = vmor %vm1573_vm9, %vm1574_vm8 }
 0x551   : > { %v1153_v5 = vpop.f32.mrf.mxu3  ;;  %v1191_v49 = vmul.f32 %v3262_v15, %v3262_v15  ;;  %v1576_v6 = vsel %vm3087_vm10, %v3023_v43, %v1572_v20  ;;  %v1586_v13 = vmul.f32 %v3048_v10, %v1585_v33  ;;  %v1599_v56 = vmul.f32 %v3075_v63, %v3042_v35 }
 0x552   : > { %v1265_v30 = vsub.f32 %v1153_v5, %v1217_v41  ;;  %v1552_v40 = vmul.f32 %v1551_v57, %v1344_v42  ;;  %v1414_v42 = vadd.f32 58.5225, %v1398_v32  ;;  %v1255_v57 = vsub.f32 %v995_v18, %v1207_v27 }
 0x553   : > { %v1239_v5 = vsub.f32 %v819_v31, %v1191_v49  ;;  %v1382_v53 = vadd.f32 6.5025, %v1366_v51  ;;  %vm1578_vm11 = vcmp.eq.f32.partialorder %v1577_v9, 8.507059e+37  ;;  %vm1589_vm12 = vweird.f32 %v3048_v10 }
 0x554   : > { %v1313_v11 = vmul.f32 2.0, %v1265_v30  ;;  %v1764_v4 = vmul.f32 0.0, %v1552_v40  ;;  %v1580_v30 = vor.u32 1.1754944e-38, %v1579_v2  ;;  %v1283_v40 = vmul.f32 2.0, %v1219_v17 }
 0x555   : > { %v3098_v46 = vmul.f32 %v1414_v42, %v1382_v53  ;;  %v1399_v59 = vadd.f32 %v1255_v57, %v1239_v5  ;;  %v1208_v16 = vmul.f32 %v3265_v24, %v3265_v24  ;;  %v1587_v58 = vadd.f32 %v3048_v10, %v1586_v13 }
 0x556   : > { %v1329_v60 = vadd.f32 58.5225, %v1313_v11  ;;  %1787 = vadd.xlane.f32.xlu2 %v1764_v4  ;;  %v1600_v3 = vsub.f32 1.0, %v1599_v56  ;;  %v3103_v8 = vpop.eup %2163  ;;  %v1220_v23 = vmul.f32 %v2718_v12, %v2682_v36  ;;  %v1367_v28 = vadd.f32 %v1207_v27, %v1191_v49  ;;  %v822_v14 = vpop.f32.mrf.mxu2 }
 0x557   : > { %v1594_v61 = vand.u32 2147483648, %v3017_v50  ;;  %vm1588_vm13 = vweird.f32 %v3017_v50  ;;  %v1592_v18 = vand.u32 2147483647, %v3017_v50  ;;  %2165 = vrcp.f32 %v3098_v46 }
 0x558   : > { %v1345_v1 = vmul.f32 %v1329_v60, %v1297_v21  ;;  %v1581_v21 = vsel %vm1578_vm11, %v1580_v30, %v1576_v6  ;;  %v1192_v60 = vmul.f32 %v3266_v0, %v3266_v0  ;;  %vm3115_vm14 = vmor %vm1588_vm13, %vm1589_vm12  ;;  %v1601_v27 = vmul.f32 %v3075_v63, %v1600_v3 }
 0x559   : > { %v1156_v41 = vpop.f32.mrf.mxu3  ;;  %v1591_v12 = vsel %vm3115_vm14, %v3048_v10, %v1587_v58  ;;  %v1614_v50 = vmul.f32 %v3103_v8, %v3069_v55  ;;  %v1284_v20 = vmul.f32 2.0, %v1220_v23  ;;  %vm1593_vm15 = vcmp.eq.f32.partialorder %v1592_v18, 8.507059e+37 }
 0x55a   : > { %v1266_v25 = vsub.f32 %v1156_v41, %v1218_v45  ;;  %v1567_v39 = vmul.f32 %v1566_v52, %v1345_v1  ;;  %v998_v45 = vpop.f32.mrf.mxu0  ;;  %v1299_v1 = vadd.f32 6.5025, %v1283_v40  ;;  %v1415_v52 = vadd.f32 58.5225, %v1399_v59 }
 0x55b   : > { %v1256_v32 = vsub.f32 %v998_v45, %v1208_v16  ;;  %v1240_v31 = vsub.f32 %v822_v14, %v1192_v60  ;;  %vm1604_vm0 = vweird.f32 %v3075_v63  ;;  %v1615_v9 = vsub.f32 1.0, %v1614_v50 }
 0x55c   : > { %v1314_v48 = vmul.f32 2.0, %v1266_v25  ;;  %v1765_v62 = vmul.f32 0.0, %v1567_v39  ;;  %v1383_v25 = vadd.f32 6.5025, %v1367_v28  ;;  %v1595_v39 = vor.u32 1.1754944e-38, %v1594_v61 }
 0x55d   : > { %v1368_v42 = vadd.f32 %v1208_v16, %v1192_v60  ;;  %v1609_v57 = vand.u32 2147483648, %v3042_v35  ;;  %vm1603_vm1 = vweird.f32 %v3042_v35  ;;  %v1607_v6 = vand.u32 2147483647, %v3042_v35 }
 0x55e   : > { %v1330_v34 = vadd.f32 58.5225, %v1314_v48  ;;  %1789 = vadd.xlane.f32.xlu2 %v1765_v62  ;;  %v3125_v49 = vmul.f32 %v1415_v52, %v1383_v25  ;;  %v1596_v2 = vsel %vm1593_vm15, %v1595_v39, %v1591_v12  ;;  %v1602_v62 = vadd.f32 %v3075_v63, %v1601_v27  ;;  %vm1605_vm2 = vmor %vm1603_vm1, %vm1604_vm0 }
 0x55f   : > { %v1300_v13 = vadd.f32 6.5025, %v1284_v20  ;;  %v1221_v56 = vmul.f32 %v2725_v22, %v2610_v44  ;;  %v1616_v40 = vmul.f32 %v3103_v8, %v1615_v9  ;;  %v1384_v35 = vadd.f32 6.5025, %v1368_v42 }
 0x560   : > { %v1346_v26 = vmul.f32 %v1330_v34, %v1298_v54  ;;  %v3129_v54 = vpop.eup %2165  ;;  %2167 = vrcp.f32 %v3125_v49  ;;  %v1606_v30 = vsel %vm1605_vm2, %v3075_v63, %v1602_v62  ;;  %v1610_v59 = vor.u32 1.1754944e-38, %v1609_v57 }
 0x561   : > { %v1159_v43 = vpop.f32.mrf.mxu3  ;;  %vm1608_vm3 = vcmp.eq.f32.partialorder %v1607_v6, 8.507059e+37  ;;  %v1285_v44 = vmul.f32 2.0, %v1221_v56  ;;  %vm1619_vm4 = vweird.f32 %v3103_v8  ;;  %v1617_v63 = vadd.f32 %v3103_v8, %v1616_v40 }
 0x562   : > { %v1267_v11 = vsub.f32 %v1159_v43, %v1219_v17  ;;  %v1582_v4 = vmul.f32 %v1581_v21, %v1346_v26  ;;  %v1400_v17 = vadd.f32 %v1256_v32, %v1240_v31  ;;  %v1629_v26 = vmul.f32 %v3129_v54, %v3098_v46 }
 0x563   : > { %v1611_v21 = vsel %vm1608_vm3, %v1610_v59, %v1606_v30  ;;  %v1624_v3 = vand.u32 2147483648, %v3069_v55  ;;  %vm1618_vm5 = vweird.f32 %v3069_v55  ;;  %v1622_v28 = vand.u32 2147483647, %v3069_v55 }
 0x564   : > { %v1315_v19 = vmul.f32 2.0, %v1267_v11  ;;  %v1766_v7 = vmul.f32 0.0, %v1582_v4  ;;  %v1416_v5 = vadd.f32 58.5225, %v1400_v17  ;;  %v1630_v4 = vsub.f32 1.0, %v1629_v26  ;;  %vm1620_vm6 = vmor %vm1618_vm5, %vm1619_vm4 }
 0x565   : > { %v1301_v61 = vadd.f32 6.5025, %v1285_v44  ;;  %v1222_v14 = vmul.f32 %v2732_v37, %v2613_v47  ;;  %v1625_v52 = vor.u32 1.1754944e-38, %v1624_v3  ;;  %vm1623_vm7 = vcmp.eq.f32.partialorder %v1622_v28, 8.507059e+37 }
 0x566   : > { %v1331_v36 = vadd.f32 58.5225, %v1315_v19  ;;  %1791 = vadd.xlane.f32.xlu2 %v1766_v7  ;;  %v3143_v22 = vmul.f32 %v1416_v5, %v1384_v35  ;;  %v3147_v58 = vpop.eup %2167  ;;  %v1621_v7 = vsel %vm1620_vm6, %v3103_v8, %v1617_v63  ;;  %v1631_v18 = vmul.f32 %v3129_v54, %v1630_v4 }
 0x567   : > { %v1286_v55 = vmul.f32 2.0, %v1222_v14  ;;  %vm1634_vm8 = vweird.f32 %v3129_v54  ;;  %v1639_v8 = vand.u32 2147483648, %v3098_v46  ;;  %vm1633_vm9 = vweird.f32 %v3098_v46 }
 0x568   : > { %v1347_v33 = vmul.f32 %v1331_v36, %v1299_v1  ;;  %2169 = vrcp.f32 %v3143_v22  ;;  %v1644_v1 = vmul.f32 %v3147_v58, %v3125_v49  ;;  %v1626_v36 = vsel %vm1623_vm7, %v1625_v52, %v1621_v7  ;;  %vm1635_vm10 = vmor %vm1633_vm9, %vm1634_vm8 }
 0x569   : > { %v1162_v51 = vpop.f32.mrf.mxu3  ;;  %v1632_v12 = vadd.f32 %v3129_v54, %v1631_v18  ;;  %v1637_v39 = vand.u32 2147483647, %v3098_v46  ;;  %v1302_v20 = vadd.f32 6.5025, %v1286_v55  ;;  %vm1649_vm12 = vweird.f32 %v3147_v58 }
 0x56a   : > { %v1268_v48 = vsub.f32 %v1162_v51, %v1220_v23  ;;  %v1597_v10 = vmul.f32 %v1596_v2, %v1347_v33  ;;  %v1645_v27 = vsub.f32 1.0, %v1644_v1  ;;  %v1223_v33 = vmul.f32 %v3261_v29, %v3262_v15 }
 0x56b   : > { %v1636_v51 = vsel %vm1635_vm10, %v3129_v54, %v1632_v12  ;;  %vm1638_vm11 = vcmp.eq.f32.partialorder %v1637_v39, 8.507059e+37  ;;  %vm1648_vm13 = vweird.f32 %v3125_v49  ;;  %vm1663_vm1 = vweird.f32 %v3143_v22 }
 0x56c   : > { %v1316_v38 = vmul.f32 2.0, %v1268_v48  ;;  %v1767_v34 = vmul.f32 0.0, %v1597_v10  ;;  %v1646_v2 = vmul.f32 %v3147_v58, %v1645_v27  ;;  %v1640_v10 = vor.u32 1.1754944e-38, %v1639_v8  ;;  %vm1650_vm14 = vmor %vm1648_vm13, %vm1649_vm12 }
 0x56d   : > { %v1287_v9 = vmul.f32 2.0, %v1223_v33 }
 0x56e   : > { %v1332_v53 = vadd.f32 58.5225, %v1316_v38  ;;  %1793 = vadd.xlane.f32.xlu2 %v1767_v34  ;;  %v2170_v50 = vpop.eup %2169  ;;  %v1641_v57 = vsel %vm1638_vm11, %v1640_v10, %v1636_v51  ;;  %v1647_v29 = vadd.f32 %v3147_v58, %v1646_v2  ;;  %v1654_v34 = vand.u32 2147483648, %v3125_v49 }
 0x56f   : > { %v1659_v48 = vmul.f32 %v2170_v50, %v3143_v22  ;;  %v1303_v5 = vadd.f32 6.5025, %v1287_v9  ;;  %vm1664_vm0 = vweird.f32 %v2170_v50 }
 0x570   : > { %v1348_v16 = vmul.f32 %v1332_v53, %v1300_v13  ;;  %v1652_v13 = vand.u32 2147483647, %v3125_v49  ;;  %v1651_v30 = vsel %vm1650_vm14, %v3147_v58, %v1647_v29  ;;  %v1655_v26 = vor.u32 1.1754944e-38, %v1654_v34  ;;  %vm1665_vm2 = vmor %vm1663_vm1, %vm1664_vm0 }
 0x571   : > { %v1165_v43 = vpop.f32.mrf.mxu3  ;;  %v1660_v15 = vsub.f32 1.0, %v1659_v48  ;;  %v1669_v49 = vand.u32 2147483648, %v3143_v22 }
 0x572   : > { %v1269_v45 = vsub.f32 %v1165_v43, %v1221_v56  ;;  %v1612_v11 = vmul.f32 %v1611_v21, %v1348_v16  ;;  %v1224_v56 = vmul.f32 %v3265_v24, %v3266_v0  ;;  %vm1653_vm15 = vcmp.eq.f32.partialorder %v1652_v13, 8.507059e+37 }
 0x573   : > { %v1661_v40 = vmul.f32 %v2170_v50, %v1660_v15  ;;  %v1656_v44 = vsel %vm1653_vm15, %v1655_v26, %v1651_v30  ;;  %v1670_v3 = vor.u32 1.1754944e-38, %v1669_v49 }
 0x574   : > { %v1317_v60 = vmul.f32 2.0, %v1269_v45  ;;  %v1768_v23 = vmul.f32 0.0, %v1612_v11  ;;  %v1288_v59 = vmul.f32 2.0, %v1224_v56  ;;  %v1667_v11 = vand.u32 2147483647, %v3143_v22 }
 0x575   : > { %v1662_v45 = vadd.f32 %v2170_v50, %v1661_v40 }
 0x576   : > { %v1333_v19 = vadd.f32 58.5225, %v1317_v60  ;;  %1795 = vadd.xlane.f32.xlu2 %v1768_v23  ;;  %v1304_v63 = vadd.f32 6.5025, %v1288_v59  ;;  %vm1668_vm3 = vcmp.eq.f32.partialorder %v1667_v11, 8.507059e+37 }
 0x577   : > { %v1666_v58 = vsel %vm1665_vm2, %v2170_v50, %v1662_v45 }
 0x578   : > { %v1349_v32 = vmul.f32 %v1333_v19, %v1301_v61  ;;  %v1671_v23 = vsel %vm1668_vm3, %v1670_v3, %v1666_v58 }
 0x579   : > { %v1168_v41 = vpop.f32.mrf.mxu3 }
 0x57a   : > { %v1270_v47 = vsub.f32 %v1168_v41, %v1222_v14  ;;  %v1627_v37 = vmul.f32 %v1626_v36, %v1349_v32 }
 0x57c   : > { %v1318_v31 = vmul.f32 2.0, %v1270_v47  ;;  %v1769_v25 = vmul.f32 0.0, %v1627_v37 }
 0x57e   : > { %v1334_v17 = vadd.f32 58.5225, %v1318_v31  ;;  %1797 = vadd.xlane.f32.xlu2 %v1769_v25 }
 0x580   : > { %v1350_v62 = vmul.f32 %v1334_v17, %v1302_v20 }
 0x581   : > { %v1171_v42 = vpop.f32.mrf.mxu3 }
 0x582   : > { %v1271_v46 = vsub.f32 %v1171_v42, %v1223_v33  ;;  %v1642_v38 = vmul.f32 %v1641_v57, %v1350_v62 }
 0x584   : > { %v1319_v54 = vmul.f32 2.0, %v1271_v46  ;;  %v1770_v6 = vmul.f32 0.0, %v1642_v38 }
 0x586   : > { %v1335_v53 = vadd.f32 58.5225, %v1319_v54  ;;  %1799 = vadd.xlane.f32.xlu2 %v1770_v6 }
 0x588   : > { %v1351_v35 = vmul.f32 %v1335_v53, %v1303_v5 }
 0x589   : > { %v1174_v16 = vpop.f32.mrf.mxu3 }
 0x58a   : > { %v1272_v43 = vsub.f32 %v1174_v16, %v1224_v56  ;;  %v1657_v21 = vmul.f32 %v1656_v44, %v1351_v35 }
 0x58c   : > { %v1320_v24 = vmul.f32 2.0, %v1272_v43  ;;  %v1771_v0 = vmul.f32 0.0, %v1657_v21 }
 0x58e   : > { %v1336_v4 = vadd.f32 58.5225, %v1320_v24  ;;  %1801 = vadd.xlane.f32.xlu2 %v1771_v0 }
 0x590   : > { %v1352_v60 = vmul.f32 %v1336_v4, %v1304_v63 }
 0x591   : > { %v1774_v14 = vpop.xlane.xlu2 %1773 }
 0x592   : > { %v1672_v28 = vmul.f32 %v1671_v23, %v1352_v60 }
 0x594   : > { %v1772_v61 = vmul.f32 0.0, %v1672_v28 }
 0x596   : > { %1803 = vadd.xlane.f32.xlu2 %v1772_v61 }
 0x599   : > { %v1776_v19 = vpop.xlane.xlu0 %1775 }
 0x59a   : > { %v1805_v18 = vadd.f32 %v1776_v19, %v1774_v14 }
 0x5a1   : > { %v1778_v7 = vpop.xlane.xlu1 %1777 }
 0x5a2   : > { %v1806_v1 = vadd.f32 %v1805_v18, %v1778_v7 }
 0x5a9   : > { %v1780_v52 = vpop.xlane.xlu2 %1779 }
 0x5aa   : > { %v1807_v32 = vadd.f32 %v1806_v1, %v1780_v52 }
 0x5b1   : > { %v1782_v22 = vpop.xlane.xlu2 %1781 }
 0x5b2   : > { %v1808_v55 = vadd.f32 %v1807_v32, %v1782_v22 }
 0x5b9   : > { %v1784_v41 = vpop.xlane.xlu2 %1783 }
 0x5ba   : > { %v1809_v31 = vadd.f32 %v1808_v55, %v1784_v41 }
 0x5c1   : > { %v1786_v36 = vpop.xlane.xlu2 %1785 }
 0x5c2   : > { %v1810_v25 = vadd.f32 %v1809_v31, %v1786_v36 }
 0x5c9   : > { %v1788_v47 = vpop.xlane.xlu2 %1787 }
 0x5ca   : > { %v1811_v20 = vadd.f32 %v1810_v25, %v1788_v47 }
 0x5d1   : > { %v1790_v37 = vpop.xlane.xlu2 %1789 }
 0x5d2   : > { %v1812_v33 = vadd.f32 %v1811_v20, %v1790_v37 }
 0x5d9   : > { %v1792_v12 = vpop.xlane.xlu2 %1791 }
 0x5da   : > { %v1813_v17 = vadd.f32 %v1812_v33, %v1792_v12 }
 0x5e1   : > { %v1794_v27 = vpop.xlane.xlu2 %1793 }
 0x5e2   : > { %v1814_v51 = vadd.f32 %v1813_v17, %v1794_v27 }
 0x5e9   : > { %v1796_v50 = vpop.xlane.xlu2 %1795 }
 0x5ea   : > { %v1815_v48 = vadd.f32 %v1814_v51, %v1796_v50 }
 0x5f1   : > { %v1798_v8 = vpop.xlane.xlu2 %1797 }
 0x5f2   : > { %v1816_v10 = vadd.f32 %v1815_v48, %v1798_v8 }
 0x5f9   : > { %v1800_v39 = vpop.xlane.xlu2 %1799 }
 0x5fa   : > { %v1817_v62 = vadd.f32 %v1816_v10, %v1800_v39 }
 0x601   : > { %v1802_v2 = vpop.xlane.xlu2 %1801 }
 0x602   : > { %v1818_v9 = vadd.f32 %v1817_v62, %v1802_v2 }
 0x609   : > { %v1804_v42 = vpop.xlane.xlu2 %1803 }
 0x60a   : > { %v1819_v57 = vadd.f32 %v1818_v9, %v1804_v42 }
 0x60c   : > { %v1820_v46 = vrot.slane %v1819_v57, 4 }
 0x60e   : > { %v1821_v38 = vadd.f32 %v1820_v46, %v1819_v57 }
 0x610   : > { %v1822_v29 = vrot.slane %v1821_v38, 2 }
 0x612   : > { %v1823_v15 = vadd.f32 %v1822_v29, %v1821_v38 }
 0x614   : > { %v1824_v34 = vrot.slane %v1823_v15, 1 }
 0x616   : > { %v1825_v54 = vadd.f32 %v1824_v34, %v1823_v15 }
 0x618   : > { %v1826_v6 = vmul.f32 0.027777778, %v1825_v54 }
 0x61a   : > { %1827 = vst [vmem:[%s291_s24] sm:$0x1] %v1826_v6 }
 0x61b   : > { %2318 = shalt.err (!%p2315_p10)
}
 0x61c   : > { %2076 = dma.vmem_to_hbm [thread:$0]  (%p2472_p0), %s1840_s12, 16, %s1842_s27, %s1829_s28  }
 0x61d PF: > { %p2101_p11 = scmp.ge.s32.totalorder %s2369_s18, 2  ;;  %s1853_s23 = sand.u32 1, %s2357_s15  }
 0x61e   : > { %s1854_s3 = scalar_lea.sflag [#allocation4], %s1853_s23 }
 0x61f   : > { %p2093_p12 = pnand %p2101_p11, %p2436_p6 }
 0x621   : > { %p2094_p13 = pneg %p2093_p12 }
 0x623   : > { %2352 = dma.done.wait (%p2094_p13), %s1854_s3, 16  }
 0x624   : > { %2354 = vsyncadd (%p2094_p13), %s1854_s3, 4294967280  ;;  %p21_p3 = scmp.ge.s32.totalorder %s2462_s10, 8   ;;  %s3269_s15 = smov %s2361_s16 }
 0x625   : > { %s3270_s16 = smov %s2365_s17  ;;  %s3271_s17 = smov %s2478_s14 }
 0x626   : > { %s3272_s18 = smov %s2462_s10  ;;  %23 = sbr.rel (!%p21_p3) target bundleno = 12 (0xc), region = 102 }
 0x62b   :  { %1859 = vsyncpa [#allocation3], 1 }
 0x62c   :  { %1861 = vsyncpa [#allocation3 + $0x1], 1 }
 0x62d   :  { %1862 = vsyncpa [#allocation6], 1 }
 0x62e   :  { %1864 = vsyncpa [#allocation6 + $0x1], 1 }
 0x62f   :  { %1865 = vsyncpa [#allocation9], 1 }
 0x630   :  { %1866 = vsyncpa [#allocation4], 1 }
 0x631   :  { %1868 = vsyncpa [#allocation4 + $0x1], 1 }

</bundles_post_ra>
